<compile_context>
chip_gen: v7x
topology: tpu7x:2x2x1
jax: 0.10.0
libtpu: 0.0.40
codegen_flags: <defaults>
</compile_context>

<pallas_src>
import numpy as np
import jax
import jax.numpy as jnp
from jax.experimental import pallas as pl
from jax.experimental.pallas import tpu as pltpu

# ---- small shapes consistent with the module structure ----
N = 2              # batch (review: raise to ~128-256 per call for throughput)
C = 64             # backbone "last_channel" (scaled down from 1536)
H = W = 8          # spatial size of the backbone feature map
HW = H * W
RED = 16           # CBAM reduction
CR = C // RED      # 4
HID1, HID2 = 1024, 512
NUM_CLASSES = 7
PAD_OUT = 128      # lane-dense padded width of the final weight matrix
BN_EPS = 1e-5


# ---------------------------------------------------------------------------
# Fused kernel: CBAM (channel + spatial attention) + global avg pool +
# classifier head (eval mode: dropout = identity, BN folded into weights).
# Input layout is (N, C, HW): channels on sublanes, spatial on lanes.
# ---------------------------------------------------------------------------
def fused_kernel(x_ref, caw1_ref, caw2_ref, abt_ref,
                 w1_hbm, b1_ref, w2_hbm, b2_ref, w3_hbm, b3_ref,
                 out_ref, feat_ref,
                 w1_v, w2_v, w3_v, dma_sem):
    # ---- Kick off classifier-weight DMAs immediately (overlap with CBAM) ----
    cp1 = pltpu.make_async_copy(w1_hbm, w1_v, dma_sem.at[0]); cp1.start()
    cp2 = pltpu.make_async_copy(w2_hbm, w2_v, dma_sem.at[1]); cp2.start()
    cp3 = pltpu.make_async_copy(w3_hbm, w3_v, dma_sem.at[2]); cp3.start()

    x = x_ref[...]                                            # (N, C, HW) f32

    # ---- Channel attention: pool over spatial, batch the tiny MLP ----
    avg_p = jnp.mean(x, axis=2)                               # (N, C)
    max_p = jnp.max(x, axis=2)                                # (N, C)
    pooled = jnp.concatenate([avg_p, max_p], axis=0)          # (2N, C)

    h = jnp.maximum(
        jnp.dot(pooled, caw1_ref[...], preferred_element_type=jnp.float32),
        0.0)                                                  # (2N, CR)
    mlp_out = jnp.dot(h, caw2_ref[...],
                      preferred_element_type=jnp.float32)     # (2N, C)
    attn_c = jax.nn.sigmoid(mlp_out[:N] + mlp_out[N:])        # (N, C)

    # ---- Apply channel attention on the full (N, C, HW) slab ----
    x_ca = x * attn_c[:, :, None]                             # (N, C, HW)

    # ---- Spatial attention: lane-dense single matmul for all batches ----
    avg_s = jnp.mean(x_ca, axis=1)                            # (N, HW)
    max_s = jnp.max(x_ca, axis=1)                             # (N, HW)
    m_rows = jnp.concatenate([avg_s, max_s], axis=1)          # (N, 2HW)
    attn_s = jax.nn.sigmoid(
        jnp.dot(m_rows, abt_ref[...],
                preferred_element_type=jnp.float32))          # (N, HW)

    # ---- AdaptiveAvgPool2d(1) + flatten ----
    x_out = x_ca * attn_s[:, None, :]                         # (N, C, HW)
    feat = jnp.mean(x_out, axis=2)                            # (N, C)
    feat_ref[...] = feat

    # ---- Classifier head (bf16 weights, f32 accumulation, BN folded) ----
    cp1.wait()
    h1 = jnp.dot(feat.astype(jnp.bfloat16), w1_v[...],
                 preferred_element_type=jnp.float32) + b1_ref[...]
    h1 = jnp.where(h1 >= 0.0, h1, 0.2 * h1)                   # LeakyReLU(0.2)
    cp2.wait()
    h2 = jnp.dot(h1.astype(jnp.bfloat16), w2_v[...],
                 preferred_element_type=jnp.float32) + b2_ref[...]
    h2 = jnp.where(h2 >= 0.0, h2, 0.2 * h2)
    cp3.wait()
    logits_pad = jnp.dot(h2.astype(jnp.bfloat16), w3_v[...],
                         preferred_element_type=jnp.float32) + b3_ref[...]
    out_ref[...] = logits_pad[:, :NUM_CLASSES]


@jax.jit
def enhanced_emotion_forward(x_nchw, prep):
    # (N, C, H, W) -> (N, C, HW): contiguous merge of trailing dims, no copy.
    x_nc_hw = x_nchw.reshape(N, C, HW)
    vmem = pl.BlockSpec(memory_space=pltpu.MemorySpace.VMEM)
    hbm = pl.BlockSpec(memory_space=pl.ANY)   # classifier weights: manual DMA

    wbytes = 2 * (C * HID1 + HID1 * HID2 + HID2 * PAD_OUT)      # bf16 weights
    flops = 2 * N * (C * HID1 + HID1 * HID2 + HID2 * PAD_OUT) + 4 * N * HW * C

    logits, feat = pl.pallas_call(
        fused_kernel,
        out_shape=(jax.ShapeDtypeStruct((N, NUM_CLASSES), jnp.float32),
                   jax.ShapeDtypeStruct((N, C), jnp.float32)),
        in_specs=[vmem,                      # x
                  vmem, vmem, vmem,          # ca_w1, ca_w2, ab_t
                  hbm, vmem,                 # w1 (HBM), b1
                  hbm, vmem,                 # w2 (HBM), b2
                  hbm, vmem],                # w3 (HBM), b3
        out_specs=(vmem, vmem),
        scratch_shapes=[pltpu.VMEM((C, HID1), jnp.bfloat16),
                        pltpu.VMEM((HID1, HID2), jnp.bfloat16),
                        pltpu.VMEM((HID2, PAD_OUT), jnp.bfloat16),
                        pltpu.SemaphoreType.DMA((3,))],
        cost_estimate=pl.CostEstimate(
            flops=flops,
            transcendentals=N * (C + HW),
            bytes_accessed=wbytes + 4 * (N * C * HW + N * C + N * NUM_CLASSES)),
    )(x_nc_hw, *prep)
    return logits, feat


# ---------------------------------------------------------------------------
# One-time parameter setup (torch-shaped params -> kernel operands).
# ---------------------------------------------------------------------------
def init_params():
    ks = jax.random.split(jax.random.PRNGKey(0), 20)

    def nrm(k, shape, fan_in):
        return jax.random.normal(k, shape, dtype=jnp.float32) / np.sqrt(fan_in)

    p = {}
    # CBAM channel attention: Conv2d(C, C/16, 1) / Conv2d(C/16, C, 1), no bias
    p["ca_fc1_w"] = nrm(ks[0], (CR, C, 1, 1), C)
    p["ca_fc2_w"] = nrm(ks[1], (C, CR, 1, 1), CR)
    # CBAM spatial attention: Conv2d(2, 1, 7, padding=3), no bias
    p["sa_conv_w"] = nrm(ks[2], (1, 2, 7, 7), 2 * 49)
    # classifier
    p["fc1_w"] = nrm(ks[3], (HID1, C), C)
    p["fc1_b"] = 0.01 * jax.random.normal(ks[4], (HID1,), dtype=jnp.float32)
    p["bn1_g"] = 1.0 + 0.1 * jax.random.normal(ks[5], (HID1,), dtype=jnp.float32)
    p["bn1_b"] = 0.1 * jax.random.normal(ks[6], (HID1,), dtype=jnp.float32)
    p["bn1_m"] = 0.1 * jax.random.normal(ks[7], (HID1,), dtype=jnp.float32)
    p["bn1_v"] = 0.5 + jax.random.uniform(ks[8], (HID1,), dtype=jnp.float32)
    p["fc2_w"] = nrm(ks[9], (HID2, HID1), HID1)
    p["fc2_b"] = 0.01 * jax.random.normal(ks[10], (HID2,), dtype=jnp.float32)
    p["bn2_g"] = 1.0 + 0.1 * jax.random.normal(ks[11], (HID2,), dtype=jnp.float32)
    p["bn2_b"] = 0.1 * jax.random.normal(ks[12], (HID2,), dtype=jnp.float32)
    p["bn2_m"] = 0.1 * jax.random.normal(ks[13], (HID2,), dtype=jnp.float32)
    p["bn2_v"] = 0.5 + jax.random.uniform(ks[14], (HID2,), dtype=jnp.float32)
    p["fc3_w"] = nrm(ks[15], (NUM_CLASSES, HID2), HID2)
    p["fc3_b"] = 0.01 * jax.random.normal(ks[16], (NUM_CLASSES,), dtype=jnp.float32)
    return p, ks[17]


def conv7x7_to_matrix(w_ch, h, w):
    """Fold a 7x7 conv tap (padding=3, stride=1) into a dense (HW, HW) matrix."""
    m = np.zeros((h * w, h * w), dtype=np.float32)
    for i in range(h):
        for j in range(w):
            p = i * w + j
            for ky in range(7):
                for kx in range(7):
                    ii, jj = i + ky - 3, j + kx - 3
                    if 0 <= ii < h and 0 <= jj < w:
                        m[p, ii * w + jj] = w_ch[ky, kx]
    return m


def prepare_params(p):
    """Host-side, one-time transform of torch-shaped params into kernel operands."""
    # CBAM channel-attention 1x1 convs as (in, out) matmul operands
    ca_w1 = jnp.transpose(p["ca_fc1_w"][:, :, 0, 0])              # (C, CR)
    ca_w2 = jnp.transpose(p["ca_fc2_w"][:, :, 0, 0])              # (CR, C)
    # 7x7 spatial-attention conv folded (once) into one dense matrix.
    # Pre-transposed so the kernel's matmul is (N, 2HW) @ (2HW, HW) (lane-dense).
    sa_w = np.asarray(p["sa_conv_w"])
    a_mat = conv7x7_to_matrix(sa_w[0, 0], H, W)                   # acts on avg map
    b_mat = conv7x7_to_matrix(sa_w[0, 1], H, W)                   # acts on max map
    abt_mat = jnp.asarray(np.concatenate([a_mat.T, b_mat.T], axis=0))  # (2HW, HW)

    # Fold BatchNorm1d (eval) into the Linear weights/biases
    s1 = p["bn1_g"] / jnp.sqrt(p["bn1_v"] + BN_EPS)
    t1 = p["bn1_b"] - p["bn1_m"] * s1
    s2 = p["bn2_g"] / jnp.sqrt(p["bn2_v"] + BN_EPS)
    t2 = p["bn2_b"] - p["bn2_m"] * s2
    w1 = (p["fc1_w"].T * s1[None, :]).astype(jnp.bfloat16)        # (C, HID1)
    b1 = (p["fc1_b"] * s1 + t1).reshape(1, HID1)
    w2 = (p["fc2_w"].T * s2[None, :]).astype(jnp.bfloat16)        # (HID1, HID2)
    b2 = (p["fc2_b"] * s2 + t2).reshape(1, HID2)
    # Pad the logits projection to a lane-dense 128-wide weight slab
    w3 = jnp.zeros((HID2, PAD_OUT), jnp.float32)
    w3 = w3.at[:, :NUM_CLASSES].set(p["fc3_w"].T).astype(jnp.bfloat16)
    b3 = jnp.zeros((1, PAD_OUT), jnp.float32).at[0, :NUM_CLASSES].set(p["fc3_b"])
    return (ca_w1, ca_w2, abt_mat, w1, b1, w2, b2, w3, b3)


# ---------------------------------------------------------------------------
# Pure-JAX reference (mirrors the PyTorch forward in eval mode) for checking.
# ---------------------------------------------------------------------------
def reference(x_nchw, p):
    hi = jax.lax.Precision.HIGHEST
    avg = jnp.mean(x_nchw, axis=(2, 3))
    mx = jnp.max(x_nchw, axis=(2, 3))
    w1 = p["ca_fc1_w"][:, :, 0, 0]
    w2 = p["ca_fc2_w"][:, :, 0, 0]

    def mlp(v):
        return jnp.dot(jnp.maximum(jnp.dot(v, w1.T, precision=hi), 0.0),
                       w2.T, precision=hi)

    attn_c = jax.nn.sigmoid(mlp(avg) + mlp(mx))[:, :, None, None]
    x_ca = x_nchw * attn_c
    avg_s = jnp.mean(x_ca, axis=1, keepdims=True)
    max_s = jnp.max(x_ca, axis=1, keepdims=True)
    x_cat = jnp.concatenate([avg_s, max_s], axis=1)
    sa = jax.lax.conv_general_dilated(
        x_cat, p["sa_conv_w"], window_strides=(1, 1),
        padding=((3, 3), (3, 3)),
        dimension_numbers=("NCHW", "OIHW", "NCHW"), precision=hi)
    x_out = x_ca * jax.nn.sigmoid(sa)
    feat = jnp.mean(x_out, axis=(2, 3))

    def bn(h, g, b, m, v):
        return (h - m) / jnp.sqrt(v + BN_EPS) * g + b

    h = jnp.dot(feat, p["fc1_w"].T, precision=hi) + p["fc1_b"]
    h = bn(h, p["bn1_g"], p["bn1_b"], p["bn1_m"], p["bn1_v"])
    h = jnp.where(h >= 0.0, h, 0.2 * h)
    h = jnp.dot(h, p["fc2_w"].T, precision=hi) + p["fc2_b"]
    h = bn(h, p["bn2_g"], p["bn2_b"], p["bn2_m"], p["bn2_v"])
    h = jnp.where(h >= 0.0, h, 0.2 * h)
    out = jnp.dot(h, p["fc3_w"].T, precision=hi) + p["fc3_b"]
    return out, feat


if __name__ == "__main__":
    params, x_key = init_params()
    prep = prepare_params(params)   # one-time setup, hoisted out of the forward path
    # input = backbone feature map (stands in for efficientnet_b3.features(x))
    x_feat = jax.random.normal(x_key, (N, C, H, W), dtype=jnp.float32)

    main_out, feat = enhanced_emotion_forward(x_feat, prep)
    jax.block_until_ready((main_out, feat))

    ref_out, ref_feat = reference(x_feat, params)
    assert main_out.shape == (N, NUM_CLASSES) and feat.shape == (N, C)
    # bf16-weight / default-precision matmuls -> compare at bf16-level tolerance
    assert np.allclose(np.asarray(feat), np.asarray(ref_feat),
                       rtol=2e-2, atol=1e-2), "features mismatch"
    assert np.allclose(np.asarray(main_out), np.asarray(ref_out),
                       rtol=2e-2, atol=2e-2), "main output mismatch"
    print("KERNEL_OK")
</pallas_src>

<mosaic_0001>
module attributes {stable_mosaic.version = 11 : i64} {
  func.func @fused_kernel(%arg0: memref<2x64x64xf32, #tpu.memory_space<vmem>>, %arg1: memref<64x4xf32, #tpu.memory_space<vmem>>, %arg2: memref<4x64xf32, #tpu.memory_space<vmem>>, %arg3: memref<128x64xf32, #tpu.memory_space<vmem>>, %arg4: memref<64x1024xbf16, #tpu.memory_space<any>>, %arg5: memref<1x1024xf32, #tpu.memory_space<vmem>>, %arg6: memref<1024x512xbf16, #tpu.memory_space<any>>, %arg7: memref<1x512xf32, #tpu.memory_space<vmem>>, %arg8: memref<512x128xbf16, #tpu.memory_space<any>>, %arg9: memref<1x128xf32, #tpu.memory_space<vmem>>, %arg10: memref<2x7xf32, #tpu.memory_space<vmem>>, %arg11: memref<2x64xf32, #tpu.memory_space<vmem>>, %arg12: memref<64x1024xbf16, #tpu.memory_space<vmem>>, %arg13: memref<1024x512xbf16, #tpu.memory_space<vmem>>, %arg14: memref<512x128xbf16, #tpu.memory_space<vmem>>, %arg15: memref<3x!tpu.dma_semaphore, #tpu.memory_space<semaphore_mem>>) attributes {dimension_semantics = [], scalar_prefetch = 0 : i64, scratch_operands = 4 : i64, tpu.core_type = #tpu.core_type<tc>} {
    %c0_i32 = arith.constant 0 : i32
    %0 = tpu.memref_slice %arg15[%c0_i32] : memref<3x!tpu.dma_semaphore, #tpu.memory_space<semaphore_mem>> -> memref<1x!tpu.dma_semaphore, #tpu.memory_space<semaphore_mem>>
    %1 = tpu.memref_squeeze %0 : memref<1x!tpu.dma_semaphore, #tpu.memory_space<semaphore_mem>> -> memref<!tpu.dma_semaphore, #tpu.memory_space<semaphore_mem>>
    tpu.enqueue_dma source(%arg4 : memref<64x1024xbf16, #tpu.memory_space<any>>) target(%arg12 : memref<64x1024xbf16, #tpu.memory_space<vmem>>) target_semaphore(%1 : memref<!tpu.dma_semaphore, #tpu.memory_space<semaphore_mem>>)
    %c1_i32 = arith.constant 1 : i32
    %2 = tpu.memref_slice %arg15[%c1_i32] : memref<3x!tpu.dma_semaphore, #tpu.memory_space<semaphore_mem>> -> memref<1x!tpu.dma_semaphore, #tpu.memory_space<semaphore_mem>>
    %3 = tpu.memref_squeeze %2 : memref<1x!tpu.dma_semaphore, #tpu.memory_space<semaphore_mem>> -> memref<!tpu.dma_semaphore, #tpu.memory_space<semaphore_mem>>
    tpu.enqueue_dma source(%arg6 : memref<1024x512xbf16, #tpu.memory_space<any>>) target(%arg13 : memref<1024x512xbf16, #tpu.memory_space<vmem>>) target_semaphore(%3 : memref<!tpu.dma_semaphore, #tpu.memory_space<semaphore_mem>>)
    %c2_i32 = arith.constant 2 : i32
    %4 = tpu.memref_slice %arg15[%c2_i32] : memref<3x!tpu.dma_semaphore, #tpu.memory_space<semaphore_mem>> -> memref<1x!tpu.dma_semaphore, #tpu.memory_space<semaphore_mem>>
    %5 = tpu.memref_squeeze %4 : memref<1x!tpu.dma_semaphore, #tpu.memory_space<semaphore_mem>> -> memref<!tpu.dma_semaphore, #tpu.memory_space<semaphore_mem>>
    tpu.enqueue_dma source(%arg8 : memref<512x128xbf16, #tpu.memory_space<any>>) target(%arg14 : memref<512x128xbf16, #tpu.memory_space<vmem>>) target_semaphore(%5 : memref<!tpu.dma_semaphore, #tpu.memory_space<semaphore_mem>>)
    %c0 = arith.constant 0 : index
    %c0_0 = arith.constant 0 : index
    %c0_1 = arith.constant 0 : index
    %6 = vector.load %arg0[%c0, %c0_0, %c0_1] : memref<2x64x64xf32, #tpu.memory_space<vmem>>, vector<2x64x64xf32>
    %cst = arith.constant dense<0.000000e+00> : vector<2x64xf32>
    %7 = vector.multi_reduction <add>, %6, %cst [2] : vector<2x64x64xf32> to vector<2x64xf32>
    %cst_2 = arith.constant 6.400000e+01 : f32
    %8 = vector.broadcast %cst_2 : f32 to vector<2x64xf32>
    %9 = arith.divf %7, %8 : vector<2x64xf32>
    %cst_3 = arith.constant dense<0xFF800000> : vector<2x64xf32>
    %10 = vector.multi_reduction <maximumf>, %6, %cst_3 [2] : vector<2x64x64xf32> to vector<2x64xf32>
    %11 = tpu.concatenate %9, %10 in 0 : vector<2x64xf32>, vector<2x64xf32> -> vector<4x64xf32>
    %c0_4 = arith.constant 0 : index
    %c0_5 = arith.constant 0 : index
    %12 = vector.load %arg1[%c0_4, %c0_5] : memref<64x4xf32, #tpu.memory_space<vmem>>, vector<64x4xf32>
    %cst_6 = arith.constant dense<0.000000e+00> : vector<4x4xf32>
    %13 = tpu.matmul %11, %12, %cst_6 {dimension_numbers = #tpu.dot_dimension_numbers<[1], [0], [0], [1], [0, 0, 1, 1], [], []>} : vector<4x64xf32>, vector<64x4xf32>, vector<4x4xf32> -> vector<4x4xf32>
    %cst_7 = arith.constant 0.000000e+00 : f32
    %14 = vector.broadcast %cst_7 : f32 to vector<4x4xf32>
    %15 = arith.maximumf %13, %14 : vector<4x4xf32>
    %c0_8 = arith.constant 0 : index
    %c0_9 = arith.constant 0 : index
    %16 = vector.load %arg2[%c0_8, %c0_9] : memref<4x64xf32, #tpu.memory_space<vmem>>, vector<4x64xf32>
    %cst_10 = arith.constant dense<0.000000e+00> : vector<4x64xf32>
    %17 = tpu.matmul %15, %16, %cst_10 {dimension_numbers = #tpu.dot_dimension_numbers<[1], [0], [0], [1], [0, 0, 1, 1], [], []>} : vector<4x4xf32>, vector<4x64xf32>, vector<4x64xf32> -> vector<4x64xf32>
    %18 = vector.extract_strided_slice %17 {offsets = [0, 0], sizes = [2, 64], strides = [1, 1]} : vector<4x64xf32> to vector<2x64xf32>
    %19 = vector.extract_strided_slice %17 {offsets = [2, 0], sizes = [2, 64], strides = [1, 1]} : vector<4x64xf32> to vector<2x64xf32>
    %20 = arith.addf %18, %19 : vector<2x64xf32>
    %21 = arith.negf %20 : vector<2x64xf32>
    %22 = math.exp %21 : vector<2x64xf32>
    %cst_11 = arith.constant 1.000000e+00 : f32
    %23 = vector.broadcast %cst_11 : f32 to vector<2x64xf32>
    %24 = arith.addf %23, %22 : vector<2x64xf32>
    %25 = arith.divf %23, %24 : vector<2x64xf32>
    %26 = vector.shape_cast %25 : vector<2x64xf32> to vector<2x64x1xf32>
    %27 = vector.broadcast %26 : vector<2x64x1xf32> to vector<2x64x64xf32>
    %28 = arith.mulf %6, %27 : vector<2x64x64xf32>
    %cst_12 = arith.constant dense<0.000000e+00> : vector<2x64xf32>
    %29 = vector.multi_reduction <add>, %28, %cst_12 [1] : vector<2x64x64xf32> to vector<2x64xf32>
    %cst_13 = arith.constant 6.400000e+01 : f32
    %30 = vector.broadcast %cst_13 : f32 to vector<2x64xf32>
    %31 = arith.divf %29, %30 : vector<2x64xf32>
    %cst_14 = arith.constant dense<0xFF800000> : vector<2x64xf32>
    %32 = vector.multi_reduction <maximumf>, %28, %cst_14 [1] : vector<2x64x64xf32> to vector<2x64xf32>
    %33 = tpu.concatenate %31, %32 in 1 : vector<2x64xf32>, vector<2x64xf32> -> vector<2x128xf32>
    %c0_15 = arith.constant 0 : index
    %c0_16 = arith.constant 0 : index
    %34 = vector.load %arg3[%c0_15, %c0_16] : memref<128x64xf32, #tpu.memory_space<vmem>>, vector<128x64xf32>
    %cst_17 = arith.constant dense<0.000000e+00> : vector<2x64xf32>
    %35 = tpu.matmul %33, %34, %cst_17 {dimension_numbers = #tpu.dot_dimension_numbers<[1], [0], [0], [1], [0, 0, 1, 1], [], []>} : vector<2x128xf32>, vector<128x64xf32>, vector<2x64xf32> -> vector<2x64xf32>
    %36 = arith.negf %35 : vector<2x64xf32>
    %37 = math.exp %36 : vector<2x64xf32>
    %cst_18 = arith.constant 1.000000e+00 : f32
    %38 = vector.broadcast %cst_18 : f32 to vector<2x64xf32>
    %39 = arith.addf %38, %37 : vector<2x64xf32>
    %40 = arith.divf %38, %39 : vector<2x64xf32>
    %41 = vector.shape_cast %40 : vector<2x64xf32> to vector<2x1x64xf32>
    %42 = vector.broadcast %41 : vector<2x1x64xf32> to vector<2x64x64xf32>
    %43 = arith.mulf %28, %42 : vector<2x64x64xf32>
    %cst_19 = arith.constant dense<0.000000e+00> : vector<2x64xf32>
    %44 = vector.multi_reduction <add>, %43, %cst_19 [2] : vector<2x64x64xf32> to vector<2x64xf32>
    %cst_20 = arith.constant 6.400000e+01 : f32
    %45 = vector.broadcast %cst_20 : f32 to vector<2x64xf32>
    %46 = arith.divf %44, %45 : vector<2x64xf32>
    %c0_21 = arith.constant 0 : index
    %c0_22 = arith.constant 0 : index
    %47 = vector.load %arg11[%c0_21, %c0_22] : memref<2x64xf32, #tpu.memory_space<vmem>>, vector<2x64xf32>
    tpu.vector_store %arg11[%c0_21, %c0_22], %46 {strides = array<i32>} : memref<2x64xf32, #tpu.memory_space<vmem>>, vector<2x64xf32>,
    %c0_i32_23 = arith.constant 0 : i32
    %48 = tpu.memref_slice %arg15[%c0_i32_23] : memref<3x!tpu.dma_semaphore, #tpu.memory_space<semaphore_mem>> -> memref<1x!tpu.dma_semaphore, #tpu.memory_space<semaphore_mem>>
    %49 = tpu.memref_squeeze %48 : memref<1x!tpu.dma_semaphore, #tpu.memory_space<semaphore_mem>> -> memref<!tpu.dma_semaphore, #tpu.memory_space<semaphore_mem>>
    tpu.wait_dma2 semaphore(%49 : memref<!tpu.dma_semaphore, #tpu.memory_space<semaphore_mem>>) src(%arg4 : memref<64x1024xbf16, #tpu.memory_space<any>>) dst(%arg12 : memref<64x1024xbf16, #tpu.memory_space<vmem>>)
    %50 = arith.truncf %46 : vector<2x64xf32> to vector<2x64xbf16>
    %c0_24 = arith.constant 0 : index
    %c0_25 = arith.constant 0 : index
    %51 = vector.load %arg12[%c0_24, %c0_25] : memref<64x1024xbf16, #tpu.memory_space<vmem>>, vector<64x1024xbf16>
    %cst_26 = arith.constant dense<0.000000e+00> : vector<2x1024xf32>
    %52 = tpu.matmul %50, %51, %cst_26 {dimension_numbers = #tpu.dot_dimension_numbers<[1], [0], [0], [1], [0, 0, 1, 1], [], []>} : vector<2x64xbf16>, vector<64x1024xbf16>, vector<2x1024xf32> -> vector<2x1024xf32>
    %c0_27 = arith.constant 0 : index
    %c0_28 = arith.constant 0 : index
    %53 = vector.load %arg5[%c0_27, %c0_28] : memref<1x1024xf32, #tpu.memory_space<vmem>>, vector<1x1024xf32>
    %54 = vector.broadcast %53 : vector<1x1024xf32> to vector<2x1024xf32>
    %55 = arith.addf %52, %54 : vector<2x1024xf32>
    %cst_29 = arith.constant 0.000000e+00 : f32
    %56 = vector.broadcast %cst_29 : f32 to vector<2x1024xf32>
    %57 = arith.cmpf oge, %55, %56 : vector<2x1024xf32>
    %cst_30 = arith.constant 2.000000e-01 : f32
    %58 = vector.broadcast %cst_30 : f32 to vector<2x1024xf32>
    %59 = arith.mulf %58, %55 : vector<2x1024xf32>
    %60 = arith.select %57, %55, %59 : vector<2x1024xi1>, vector<2x1024xf32>
    %c1_i32_31 = arith.constant 1 : i32
    %61 = tpu.memref_slice %arg15[%c1_i32_31] : memref<3x!tpu.dma_semaphore, #tpu.memory_space<semaphore_mem>> -> memref<1x!tpu.dma_semaphore, #tpu.memory_space<semaphore_mem>>
    %62 = tpu.memref_squeeze %61 : memref<1x!tpu.dma_semaphore, #tpu.memory_space<semaphore_mem>> -> memref<!tpu.dma_semaphore, #tpu.memory_space<semaphore_mem>>
    tpu.wait_dma2 semaphore(%62 : memref<!tpu.dma_semaphore, #tpu.memory_space<semaphore_mem>>) src(%arg6 : memref<1024x512xbf16, #tpu.memory_space<any>>) dst(%arg13 : memref<1024x512xbf16, #tpu.memory_space<vmem>>)
    %63 = arith.truncf %60 : vector<2x1024xf32> to vector<2x1024xbf16>
    %c0_32 = arith.constant 0 : index
    %c0_33 = arith.constant 0 : index
    %64 = vector.load %arg13[%c0_32, %c0_33] : memref<1024x512xbf16, #tpu.memory_space<vmem>>, vector<1024x512xbf16>
    %cst_34 = arith.constant dense<0.000000e+00> : vector<2x512xf32>
    %65 = tpu.matmul %63, %64, %cst_34 {dimension_numbers = #tpu.dot_dimension_numbers<[1], [0], [0], [1], [0, 0, 1, 1], [], []>} : vector<2x1024xbf16>, vector<1024x512xbf16>, vector<2x512xf32> -> vector<2x512xf32>
    %c0_35 = arith.constant 0 : index
    %c0_36 = arith.constant 0 : index
    %66 = vector.load %arg7[%c0_35, %c0_36] : memref<1x512xf32, #tpu.memory_space<vmem>>, vector<1x512xf32>
    %67 = vector.broadcast %66 : vector<1x512xf32> to vector<2x512xf32>
    %68 = arith.addf %65, %67 : vector<2x512xf32>
    %cst_37 = arith.constant 0.000000e+00 : f32
    %69 = vector.broadcast %cst_37 : f32 to vector<2x512xf32>
    %70 = arith.cmpf oge, %68, %69 : vector<2x512xf32>
    %cst_38 = arith.constant 2.000000e-01 : f32
    %71 = vector.broadcast %cst_38 : f32 to vector<2x512xf32>
    %72 = arith.mulf %71, %68 : vector<2x512xf32>
    %73 = arith.select %70, %68, %72 : vector<2x512xi1>, vector<2x512xf32>
    %c2_i32_39 = arith.constant 2 : i32
    %74 = tpu.memref_slice %arg15[%c2_i32_39] : memref<3x!tpu.dma_semaphore, #tpu.memory_space<semaphore_mem>> -> memref<1x!tpu.dma_semaphore, #tpu.memory_space<semaphore_mem>>
    %75 = tpu.memref_squeeze %74 : memref<1x!tpu.dma_semaphore, #tpu.memory_space<semaphore_mem>> -> memref<!tpu.dma_semaphore, #tpu.memory_space<semaphore_mem>>
    tpu.wait_dma2 semaphore(%75 : memref<!tpu.dma_semaphore, #tpu.memory_space<semaphore_mem>>) src(%arg8 : memref<512x128xbf16, #tpu.memory_space<any>>) dst(%arg14 : memref<512x128xbf16, #tpu.memory_space<vmem>>)
    %76 = arith.truncf %73 : vector<2x512xf32> to vector<2x512xbf16>
    %c0_40 = arith.constant 0 : index
    %c0_41 = arith.constant 0 : index
    %77 = vector.load %arg14[%c0_40, %c0_41] : memref<512x128xbf16, #tpu.memory_space<vmem>>, vector<512x128xbf16>
    %cst_42 = arith.constant dense<0.000000e+00> : vector<2x128xf32>
    %78 = tpu.matmul %76, %77, %cst_42 {dimension_numbers = #tpu.dot_dimension_numbers<[1], [0], [0], [1], [0, 0, 1, 1], [], []>} : vector<2x512xbf16>, vector<512x128xbf16>, vector<2x128xf32> -> vector<2x128xf32>
    %c0_43 = arith.constant 0 : index
    %c0_44 = arith.constant 0 : index
    %79 = vector.load %arg9[%c0_43, %c0_44] : memref<1x128xf32, #tpu.memory_space<vmem>>, vector<1x128xf32>
    %80 = vector.broadcast %79 : vector<1x128xf32> to vector<2x128xf32>
    %81 = arith.addf %78, %80 : vector<2x128xf32>
    %82 = vector.extract_strided_slice %81 {offsets = [0, 0], sizes = [2, 7], strides = [1, 1]} : vector<2x128xf32> to vector<2x7xf32>
    %c0_45 = arith.constant 0 : index
    %c0_46 = arith.constant 0 : index
    %83 = vector.load %arg10[%c0_45, %c0_46] : memref<2x7xf32, #tpu.memory_space<vmem>>, vector<2x7xf32>
    tpu.vector_store %arg10[%c0_45, %c0_46], %82 {strides = array<i32>} : memref<2x7xf32, #tpu.memory_space<vmem>>, vector<2x7xf32>,
    return
  }
}

</mosaic_0001>

<bundles_post_ra>
// kernel: enhanced_emotion_forward.1
= control target key start
LH: loop header
LB: loop body
LE: loop exit
PB: predicated region body
PF: predicated region fallthrough
CT: control target
= control target key end

     0   :  { %17 = vsyncpa [#allocation7], 0  ;;  %s4145_s0 = inlined_call_operand.vmem [shape: f32[2,64,64], index: 0, kind: input, shape index: {}]   ;;  %s4146_s1 = inlined_call_operand.vmem [shape: f32[64,4], index: 1, kind: input, shape index: {}]   ;;  %s4147_s2 = inlined_call_operand.hbm [shape: f32[4,64], index: 2, kind: input, shape index: {}]   ;;  %s4148_s3 = inlined_call_operand.vmem [shape: f32[128,64], index: 3, kind: input, shape index: {}]   ;;  %s4149_s4 = inlined_call_operand.vmem [shape: bf16[64,1024], index: 4, kind: input, shape index: {}]   ;;  %s4150_s5 = inlined_call_operand.vmem [shape: f32[1,1024], index: 5, kind: input, shape index: {}]   ;;  %s4151_s6 = inlined_call_operand.hbm [shape: bf16[1024,512], index: 6, kind: input, shape index: {}]   ;;  %s4152_s7 = inlined_call_operand.vmem [shape: f32[1,512], index: 7, kind: input, shape index: {}]   ;;  %s4153_s8 = inlined_call_operand.vmem [shape: bf16[512,128], index: 8, kind: input, shape index: {}]   ;;  %s4154_s9 = inlined_call_operand.vmem [shape: f32[1,128], index: 9, kind: input, shape index: {}]   ;;  %s4155_s10 = inlined_call_operand.hbm [shape: f32[2,7], index: 10, kind: output, shape index: {0}]   ;;  %s4156_s11 = inlined_call_operand.hbm [shape: f32[2,64], index: 11, kind: output, shape index: {1}]  }
   0x1   :  { %18 = vsyncpa [#allocation8], 0 }
   0x2   :  { %19 = vsyncpa [#allocation11], 0  ;;  %s3014_s17 = smov [#allocation6]   ;;  %s2936_s21 = scalar_lea.hbm %s4147_s2, 64 }
   0x3   :  { %s30_s18 = sshll.u32 %s3014_s17, 4  ;;  %p2937_p0 = scmp.ne.s32.totalorder %s4147_s2, %s2936_s21  ;;  %s31_s18 = int_to_ptr.vmem [resolvable:$true] %s30_s18 }
   0x4   :  { %p2940_p1 = scmp.lt.u32.totalorder %s2936_s21, %s4147_s2 }
   0x6   :  { %p2942_p2 = pnand %p2940_p1, %p2937_p0 }
   0x8   :  { %2945 = shalt.err (!%p2942_p2)
}
   0x9   :  { %s2946_s26 = scalar_lea.vmem %s31_s18, 64  ;;  %p2951_p4 = scmp.lt.s32.totalorder %s31_s18, %s31_s18 }
   0xa   :  { %p2947_p3 = scmp.ne.s32.totalorder %s31_s18, %s2946_s26  ;;  %p2952_p5 = scmp.lt.s32.totalorder %s2946_s26, %s2946_s26 }
   0xc   :  { %p2953_p6 = por %p2952_p5, %p2951_p4 }
   0xe   :  { %p2954_p7 = pnand %p2953_p6, %p2947_p3 }
  0x10   :  { %2957 = shalt.err (!%p2954_p7)
}
  0x11   :  { %33 = dma.hbm_to_vmem [thread:$0]  %s4147_s2, 64, %s31_s18, [#allocation7]  }
  0x12   :  { %3002 = dma.done.wait [#allocation7], 64  }
  0x13   :  { %3003 = vsyncadd [#allocation7], 4294967232  ;;  %v63_v0 = vld [vmem:[%s4149_s4] sm:$0xf]  ;;  %v67_v2 = vld [vmem:[%s4149_s4 + $0x4] sm:$0xf] }
  0x14   :  { %v65_v1 = vld [vmem:[%s4149_s4 + $0x20] sm:$0xf]  ;;  %64 = vst [vmem:[#allocation2] sm:$0xf] %v63_v0  ;;  %68 = vst [vmem:[#allocation2 + $0x8] sm:$0xf] %v67_v2 }
  0x15   :  { %66 = vst [vmem:[#allocation2 + $0x4] sm:$0xf] %v65_v1  ;;  %v69_v3 = vld [vmem:[%s4149_s4 + $0x24] sm:$0xf]  ;;  %v71_v4 = vld [vmem:[%s4149_s4 + $0x8] sm:$0xf] }
  0x16   :  { %v73_v5 = vld [vmem:[%s4149_s4 + $0x28] sm:$0xf]  ;;  %70 = vst [vmem:[#allocation2 + $0xc] sm:$0xf] %v69_v3  ;;  %72 = vst [vmem:[#allocation2 + $0x10] sm:$0xf] %v71_v4 }
  0x17   :  { %74 = vst [vmem:[#allocation2 + $0x14] sm:$0xf] %v73_v5  ;;  %v75_v6 = vld [vmem:[%s4149_s4 + $0xc] sm:$0xf]  ;;  %v79_v8 = vld [vmem:[%s4149_s4 + $0x10] sm:$0xf] }
  0x18   :  { %v77_v7 = vld [vmem:[%s4149_s4 + $0x2c] sm:$0xf]  ;;  %76 = vst [vmem:[#allocation2 + $0x18] sm:$0xf] %v75_v6  ;;  %80 = vst [vmem:[#allocation2 + $0x20] sm:$0xf] %v79_v8 }
  0x19   :  { %78 = vst [vmem:[#allocation2 + $0x1c] sm:$0xf] %v77_v7  ;;  %v81_v9 = vld [vmem:[%s4149_s4 + $0x30] sm:$0xf]  ;;  %v83_v10 = vld [vmem:[%s4149_s4 + $0x14] sm:$0xf] }
  0x1a   :  { %v85_v11 = vld [vmem:[%s4149_s4 + $0x34] sm:$0xf]  ;;  %82 = vst [vmem:[#allocation2 + $0x24] sm:$0xf] %v81_v9  ;;  %84 = vst [vmem:[#allocation2 + $0x28] sm:$0xf] %v83_v10 }
  0x1b   :  { %86 = vst [vmem:[#allocation2 + $0x2c] sm:$0xf] %v85_v11  ;;  %v87_v12 = vld [vmem:[%s4149_s4 + $0x18] sm:$0xf]  ;;  %v91_v14 = vld [vmem:[%s4149_s4 + $0x1c] sm:$0xf] }
  0x1c   :  { %v89_v13 = vld [vmem:[%s4149_s4 + $0x38] sm:$0xf]  ;;  %88 = vst [vmem:[#allocation2 + $0x30] sm:$0xf] %v87_v12  ;;  %92 = vst [vmem:[#allocation2 + $0x38] sm:$0xf] %v91_v14 }
  0x1d   :  { %90 = vst [vmem:[#allocation2 + $0x34] sm:$0xf] %v89_v13  ;;  %v93_v15 = vld [vmem:[%s4149_s4 + $0x3c] sm:$0xff]   ;;  %v99_v17 = vld [vmem:[%s4149_s4 + $0x44] sm:$0xf] }
  0x1e   :  { %v97_v16 = vld [vmem:[%s4149_s4 + $0x60] sm:$0xf]  ;;  %94 = vst [vmem:[#allocation2 + $0x3c] sm:$0xff] %v93_v15   ;;  %100 = vst [vmem:[#allocation2 + $0x48] sm:$0xf] %v99_v17 }
  0x1f   :  { %98 = vst [vmem:[#allocation2 + $0x44] sm:$0xf] %v97_v16  ;;  %v101_v18 = vld [vmem:[%s4149_s4 + $0x64] sm:$0xf]  ;;  %v103_v19 = vld [vmem:[%s4149_s4 + $0x48] sm:$0xf] }
  0x20   :  { %v105_v20 = vld [vmem:[%s4149_s4 + $0x68] sm:$0xf]  ;;  %102 = vst [vmem:[#allocation2 + $0x4c] sm:$0xf] %v101_v18  ;;  %104 = vst [vmem:[#allocation2 + $0x50] sm:$0xf] %v103_v19 }
  0x21   :  { %106 = vst [vmem:[#allocation2 + $0x54] sm:$0xf] %v105_v20  ;;  %v107_v21 = vld [vmem:[%s4149_s4 + $0x4c] sm:$0xf]  ;;  %v111_v23 = vld [vmem:[%s4149_s4 + $0x50] sm:$0xf] }
  0x22   :  { %v109_v22 = vld [vmem:[%s4149_s4 + $0x6c] sm:$0xf]  ;;  %108 = vst [vmem:[#allocation2 + $0x58] sm:$0xf] %v107_v21  ;;  %112 = vst [vmem:[#allocation2 + $0x60] sm:$0xf] %v111_v23 }
  0x23   :  { %110 = vst [vmem:[#allocation2 + $0x5c] sm:$0xf] %v109_v22  ;;  %v113_v24 = vld [vmem:[%s4149_s4 + $0x70] sm:$0xf]  ;;  %v115_v25 = vld [vmem:[%s4149_s4 + $0x54] sm:$0xf] }
  0x24   :  { %v117_v26 = vld [vmem:[%s4149_s4 + $0x74] sm:$0xf]  ;;  %114 = vst [vmem:[#allocation2 + $0x64] sm:$0xf] %v113_v24  ;;  %116 = vst [vmem:[#allocation2 + $0x68] sm:$0xf] %v115_v25 }
  0x25   :  { %118 = vst [vmem:[#allocation2 + $0x6c] sm:$0xf] %v117_v26  ;;  %v119_v27 = vld [vmem:[%s4149_s4 + $0x58] sm:$0xf]  ;;  %v123_v29 = vld [vmem:[%s4149_s4 + $0x5c] sm:$0xf] }
  0x26   :  { %v121_v28 = vld [vmem:[%s4149_s4 + $0x78] sm:$0xf]  ;;  %120 = vst [vmem:[#allocation2 + $0x70] sm:$0xf] %v119_v27  ;;  %124 = vst [vmem:[#allocation2 + $0x78] sm:$0xf] %v123_v29 }
  0x27   :  { %122 = vst [vmem:[#allocation2 + $0x74] sm:$0xf] %v121_v28  ;;  %v125_v30 = vld [vmem:[%s4149_s4 + $0x7c] sm:$0xff]   ;;  %v131_v32 = vld [vmem:[%s4149_s4 + $0x84] sm:$0xf] }
  0x28   :  { %v129_v31 = vld [vmem:[%s4149_s4 + $0xa0] sm:$0xf]  ;;  %126 = vst [vmem:[#allocation2 + $0x7c] sm:$0xff] %v125_v30   ;;  %132 = vst [vmem:[#allocation2 + $0x88] sm:$0xf] %v131_v32 }
  0x29   :  { %130 = vst [vmem:[#allocation2 + $0x84] sm:$0xf] %v129_v31  ;;  %v133_v33 = vld [vmem:[%s4149_s4 + $0xa4] sm:$0xf]  ;;  %v135_v34 = vld [vmem:[%s4149_s4 + $0x88] sm:$0xf] }
  0x2a   :  { %v137_v35 = vld [vmem:[%s4149_s4 + $0xa8] sm:$0xf]  ;;  %134 = vst [vmem:[#allocation2 + $0x8c] sm:$0xf] %v133_v33  ;;  %136 = vst [vmem:[#allocation2 + $0x90] sm:$0xf] %v135_v34 }
  0x2b   :  { %138 = vst [vmem:[#allocation2 + $0x94] sm:$0xf] %v137_v35  ;;  %v139_v36 = vld [vmem:[%s4149_s4 + $0x8c] sm:$0xf]  ;;  %v143_v38 = vld [vmem:[%s4149_s4 + $0x90] sm:$0xf] }
  0x2c   :  { %v141_v37 = vld [vmem:[%s4149_s4 + $0xac] sm:$0xf]  ;;  %140 = vst [vmem:[#allocation2 + $0x98] sm:$0xf] %v139_v36  ;;  %144 = vst [vmem:[#allocation2 + $0xa0] sm:$0xf] %v143_v38 }
  0x2d   :  { %142 = vst [vmem:[#allocation2 + $0x9c] sm:$0xf] %v141_v37  ;;  %v145_v39 = vld [vmem:[%s4149_s4 + $0xb0] sm:$0xf]  ;;  %v147_v40 = vld [vmem:[%s4149_s4 + $0x94] sm:$0xf] }
  0x2e   :  { %v149_v41 = vld [vmem:[%s4149_s4 + $0xb4] sm:$0xf]  ;;  %146 = vst [vmem:[#allocation2 + $0xa4] sm:$0xf] %v145_v39  ;;  %148 = vst [vmem:[#allocation2 + $0xa8] sm:$0xf] %v147_v40 }
  0x2f   :  { %150 = vst [vmem:[#allocation2 + $0xac] sm:$0xf] %v149_v41  ;;  %v151_v42 = vld [vmem:[%s4149_s4 + $0x98] sm:$0xf]  ;;  %v155_v44 = vld [vmem:[%s4149_s4 + $0x9c] sm:$0xf] }
  0x30   :  { %v153_v43 = vld [vmem:[%s4149_s4 + $0xb8] sm:$0xf]  ;;  %152 = vst [vmem:[#allocation2 + $0xb0] sm:$0xf] %v151_v42  ;;  %156 = vst [vmem:[#allocation2 + $0xb8] sm:$0xf] %v155_v44 }
  0x31   :  { %154 = vst [vmem:[#allocation2 + $0xb4] sm:$0xf] %v153_v43  ;;  %v157_v45 = vld [vmem:[%s4149_s4 + $0xbc] sm:$0xff]   ;;  %v163_v47 = vld [vmem:[%s4149_s4 + $0xc4] sm:$0xf] }
  0x32   :  { %v161_v46 = vld [vmem:[%s4149_s4 + $0xe0] sm:$0xf]  ;;  %158 = vst [vmem:[#allocation2 + $0xbc] sm:$0xff] %v157_v45   ;;  %164 = vst [vmem:[#allocation2 + $0xc8] sm:$0xf] %v163_v47 }
  0x33   :  { %162 = vst [vmem:[#allocation2 + $0xc4] sm:$0xf] %v161_v46  ;;  %v165_v48 = vld [vmem:[%s4149_s4 + $0xe4] sm:$0xf]  ;;  %v167_v49 = vld [vmem:[%s4149_s4 + $0xc8] sm:$0xf] }
  0x34   :  { %v169_v50 = vld [vmem:[%s4149_s4 + $0xe8] sm:$0xf]  ;;  %166 = vst [vmem:[#allocation2 + $0xcc] sm:$0xf] %v165_v48  ;;  %168 = vst [vmem:[#allocation2 + $0xd0] sm:$0xf] %v167_v49 }
  0x35   :  { %170 = vst [vmem:[#allocation2 + $0xd4] sm:$0xf] %v169_v50  ;;  %v171_v51 = vld [vmem:[%s4149_s4 + $0xcc] sm:$0xf]  ;;  %v175_v53 = vld [vmem:[%s4149_s4 + $0xd0] sm:$0xf] }
  0x36   :  { %v173_v52 = vld [vmem:[%s4149_s4 + $0xec] sm:$0xf]  ;;  %172 = vst [vmem:[#allocation2 + $0xd8] sm:$0xf] %v171_v51  ;;  %176 = vst [vmem:[#allocation2 + $0xe0] sm:$0xf] %v175_v53 }
  0x37   :  { %174 = vst [vmem:[#allocation2 + $0xdc] sm:$0xf] %v173_v52  ;;  %v177_v54 = vld [vmem:[%s4149_s4 + $0xf0] sm:$0xf]  ;;  %v179_v55 = vld [vmem:[%s4149_s4 + $0xd4] sm:$0xf] }
  0x38   :  { %v181_v56 = vld [vmem:[%s4149_s4 + $0xf4] sm:$0xf]  ;;  %178 = vst [vmem:[#allocation2 + $0xe4] sm:$0xf] %v177_v54  ;;  %180 = vst [vmem:[#allocation2 + $0xe8] sm:$0xf] %v179_v55 }
  0x39   :  { %182 = vst [vmem:[#allocation2 + $0xec] sm:$0xf] %v181_v56  ;;  %v183_v57 = vld [vmem:[%s4149_s4 + $0xd8] sm:$0xf]  ;;  %v187_v59 = vld [vmem:[%s4149_s4 + $0xdc] sm:$0xf] }
  0x3a   :  { %v185_v58 = vld [vmem:[%s4149_s4 + $0xf8] sm:$0xf]  ;;  %184 = vst [vmem:[#allocation2 + $0xf0] sm:$0xf] %v183_v57  ;;  %188 = vst [vmem:[#allocation2 + $0xf8] sm:$0xf] %v187_v59 }
  0x3b   :  { %186 = vst [vmem:[#allocation2 + $0xf4] sm:$0xf] %v185_v58  ;;  %v189_v60 = vld [vmem:[%s4149_s4 + $0xfc] sm:$0xf] }
  0x3c   :  { %190 = vst [vmem:[#allocation2 + $0xfc] sm:$0xf] %v189_v60 }
  0x3d   :  { %349 = vsyncadd [#allocation5], 4096  ;;  %s355_s12 = sld [smem:[#allocation0]]   ;;  %s3015_s13 = smov [#allocation3]   ;;  %vm507_vm0 = vcmask 523264  }
  0x3e   :  { %s363_s14 = sshll.u32 %s3015_s13, 4  ;;  %s3016_s15 = smov 512   ;;  %s364_s14 = int_to_ptr.vmem [resolvable:$true] %s363_s14 }
  0x3f   :  { %367 = sst [smem:[#allocation14]] %s3016_s15  ;;  %s3017_s16 = smov 4  }
  0x40   :  { %369 = sst [smem:[#allocation14 + $0x1]] %s3016_s15  ;;  %s3018_s17 = smov 64  }
  0x41   :  { %371 = sst [smem:[#allocation14 + $0x2]] %s3017_s16  ;;  %s3019_s18 = smov 128  }
  0x42   :  { %373 = sst [smem:[#allocation14 + $0x3]] %s3018_s17  ;;  %s3020_s20 = smov 2  }
  0x43   :  { %s2701_s2 = sshll.u32 %s355_s12, 26  ;;  %375 = sst [smem:[#allocation14 + $0x4]] %s3019_s18 }
  0x44   :  { %s2702_s19 = sadd.s32 134217728, %s2701_s2  ;;  %377 = sst [smem:[#allocation14 + $0x5]] %s3020_s20 }
  0x45   :  { %s3021_s4 = smov 256   ;;  %381 = sst [smem:[#allocation14 + $0x7]] %s3018_s17 }
  0x46   :  { %379 = sst [smem:[#allocation14 + $0x6]] %s3021_s4  ;;  %s3022_s21 = smov [#allocation5 + $0x1]  }
  0x47   :  { %383 = sst [smem:[#allocation14 + $0x8]] %s3017_s16  ;;  %s3023_s22 = smov [#allocation13]  }
  0x48   :  { %385 = dma.general %s4151_s6, 32768, %s364_s14, %s3022_s21, %s3023_s22, [#allocation14], %s2702_s19, 0  }
  0x49   :  { %v3294_v61 = vld [vmem:[%s4153_s8] sm:$0xff]  ;;  %v3299_v62 = vld [vmem:[%s4153_s8 + $0x8] sm:$0xff]  ;;  %v3304_v63 = vld [vmem:[%s4153_s8 + $0x10] sm:$0xff] }
  0x4a   :  { %4160 = vst [vmem:[#allocation22_spill] sm:$0xff] %v3294_v61  ;;  %4161 = vst [vmem:[#allocation23_spill] sm:$0xff] %v3299_v62  ;;  %v3309_v0 = vld [vmem:[%s4153_s8 + $0x18] sm:$0xff]  ;;  %v3314_v1 = vld [vmem:[%s4153_s8 + $0x20] sm:$0xff] }
  0x4b   :  { %4162 = vst [vmem:[#allocation24_spill] sm:$0xff] %v3304_v63  ;;  %4163 = vst [vmem:[#allocation25_spill] sm:$0xff] %v3309_v0  ;;  %v3319_v2 = vld [vmem:[%s4153_s8 + $0x28] sm:$0xff]  ;;  %v3324_v3 = vld [vmem:[%s4153_s8 + $0x30] sm:$0xff] }
  0x4c   :  { %4164 = vst [vmem:[#allocation26_spill] sm:$0xff] %v3314_v1  ;;  %4165 = vst [vmem:[#allocation27_spill] sm:$0xff] %v3319_v2  ;;  %v3329_v4 = vld [vmem:[%s4153_s8 + $0x38] sm:$0xff]  ;;  %v3334_v5 = vld [vmem:[%s4153_s8 + $0x40] sm:$0xff] }
  0x4d   :  { %4166 = vst [vmem:[#allocation28_spill] sm:$0xff] %v3324_v3  ;;  %4167 = vst [vmem:[#allocation29_spill] sm:$0xff] %v3329_v4  ;;  %v3339_v6 = vld [vmem:[%s4153_s8 + $0x48] sm:$0xff]  ;;  %v3344_v7 = vld [vmem:[%s4153_s8 + $0x50] sm:$0xff] }
  0x4e   :  { %4168 = vst [vmem:[#allocation30_spill] sm:$0xff] %v3339_v6  ;;  %4169 = vst [vmem:[#allocation31_spill] sm:$0xff] %v3344_v7  ;;  %v3349_v8 = vld [vmem:[%s4153_s8 + $0x58] sm:$0xff]  ;;  %v3354_v9 = vld [vmem:[%s4153_s8 + $0x60] sm:$0xff] }
  0x4f   :  { %4170 = vst [vmem:[#allocation32_spill] sm:$0xff] %v3349_v8  ;;  %4171 = vst [vmem:[#allocation33_spill] sm:$0xff] %v3354_v9  ;;  %v3359_v10 = vld [vmem:[%s4153_s8 + $0x68] sm:$0xff]  ;;  %v3364_v11 = vld [vmem:[%s4153_s8 + $0x70] sm:$0xff] }
  0x50   :  { %4172 = vst [vmem:[#allocation34_spill] sm:$0xff] %v3359_v10  ;;  %4173 = vst [vmem:[#allocation35_spill] sm:$0xff] %v3364_v11  ;;  %v3369_v12 = vld [vmem:[%s4153_s8 + $0x78] sm:$0xff]  ;;  %v3374_v13 = vld [vmem:[%s4153_s8 + $0x80] sm:$0xff] }
  0x51   :  { %4174 = vst [vmem:[#allocation36_spill] sm:$0xff] %v3369_v12  ;;  %4175 = vst [vmem:[#allocation37_spill] sm:$0xff] %v3374_v13  ;;  %v3379_v14 = vld [vmem:[%s4153_s8 + $0x88] sm:$0xff]  ;;  %v3384_v15 = vld [vmem:[%s4153_s8 + $0x90] sm:$0xff] }
  0x52   :  { %4176 = vst [vmem:[#allocation38_spill] sm:$0xff] %v3379_v14  ;;  %4177 = vst [vmem:[#allocation39_spill] sm:$0xff] %v3384_v15  ;;  %v3389_v16 = vld [vmem:[%s4153_s8 + $0x98] sm:$0xff]  ;;  %v3394_v17 = vld [vmem:[%s4153_s8 + $0xa0] sm:$0xff] }
  0x53   :  { %4178 = vst [vmem:[#allocation40_spill] sm:$0xff] %v3389_v16  ;;  %4179 = vst [vmem:[#allocation41_spill] sm:$0xff] %v3394_v17  ;;  %v3399_v18 = vld [vmem:[%s4153_s8 + $0xa8] sm:$0xff]  ;;  %v3404_v19 = vld [vmem:[%s4153_s8 + $0xb0] sm:$0xff] }
  0x54   :  { %4180 = vst [vmem:[#allocation42_spill] sm:$0xff] %v3399_v18  ;;  %4181 = vst [vmem:[#allocation43_spill] sm:$0xff] %v3404_v19  ;;  %v3409_v20 = vld [vmem:[%s4153_s8 + $0xb8] sm:$0xff]  ;;  %v3414_v21 = vld [vmem:[%s4153_s8 + $0xc0] sm:$0xff] }
  0x55   :  { %4182 = vst [vmem:[#allocation44_spill] sm:$0xff] %v3409_v20  ;;  %4183 = vst [vmem:[#allocation45_spill] sm:$0xff] %v3414_v21  ;;  %v3419_v22 = vld [vmem:[%s4153_s8 + $0xc8] sm:$0xff]  ;;  %v3424_v23 = vld [vmem:[%s4153_s8 + $0xd0] sm:$0xff] }
  0x56   :  { %4184 = vst [vmem:[#allocation46_spill] sm:$0xff] %v3419_v22  ;;  %4185 = vst [vmem:[#allocation47_spill] sm:$0xff] %v3424_v23  ;;  %v3429_v24 = vld [vmem:[%s4153_s8 + $0xd8] sm:$0xff]  ;;  %v3434_v25 = vld [vmem:[%s4153_s8 + $0xe0] sm:$0xff] }
  0x57   :  { %4186 = vst [vmem:[#allocation48_spill] sm:$0xff] %v3429_v24  ;;  %4187 = vst [vmem:[#allocation49_spill] sm:$0xff] %v3434_v25  ;;  %v3439_v26 = vld [vmem:[%s4153_s8 + $0xe8] sm:$0xff]  ;;  %v3444_v27 = vld [vmem:[%s4153_s8 + $0xf0] sm:$0xff] }
  0x58   :  { %4188 = vst [vmem:[#allocation50_spill] sm:$0xff] %v3439_v26  ;;  %4189 = vst [vmem:[#allocation51_spill] sm:$0xff] %v3444_v27  ;;  %v3449_v28 = vld [vmem:[%s4153_s8 + $0xf8] sm:$0xff]  ;;  %v3454_v29 = vld [vmem:[%s4145_s0 + $0x40] sm:$0xff] }
  0x59   :  { %4190 = vst [vmem:[#allocation52_spill] sm:$0xff] %v3449_v28  ;;  %v3459_v30 = vld [vmem:[%s4145_s0] sm:$0xff]  ;;  %v3464_v31 = vld [vmem:[%s4145_s0 + $0x48] sm:$0xff]  ;;  %v532_v32 = vsel %vm507_vm0, %v3454_v29, 0.0  ;;  %v3482_v37 = vld [vmem:[%s4145_s0 + $0x50] sm:$0xff] }
  0x5a   :  { %v508_v33 = vsel %vm507_vm0, %v3459_v30, 0.0  ;;  %v3473_v34 = vld [vmem:[%s4145_s0 + $0x8] sm:$0xff]  ;;  %533 = vadd.xlane.f32.xlu1 %v532_v32  ;;  %v535_v35 = vsel %vm507_vm0, %v3464_v31, 0.0  ;;  %v3487_v38 = vld [vmem:[%s4145_s0 + $0x10] sm:$0xff]  ;;  %v538_v39 = vsel %vm507_vm0, %v3482_v37, 0.0 }
  0x5b   :  { %509 = vadd.xlane.f32.xlu0 %v508_v33  ;;  %v511_v36 = vsel %vm507_vm0, %v3473_v34, 0.0  ;;  %v514_v40 = vsel %vm507_vm0, %v3487_v38, 0.0 }
  0x5e   :  { %536 = vadd.xlane.f32.xlu1 %v535_v35 }
  0x5f   :  { %512 = vadd.xlane.f32.xlu0 %v511_v36 }
  0x60   :  { %490 = vsyncadd [#allocation5 + $0x2], 4096  ;;  %v3496_v41 = vld [vmem:[%s4145_s0 + $0x58] sm:$0xff]  ;;  %v576_v45 = vsel %vm507_vm0, %v3473_v34, -inf  ;;  %v573_v46 = vsel %vm507_vm0, %v3459_v30, -inf  ;;  %v600_v47 = vsel %vm507_vm0, %v3464_v31, -inf  ;;  %v637_v20 = vlaneseq }
  0x61   :  { %v3501_v42 = vld [vmem:[%s4145_s0 + $0x18] sm:$0xff]  ;;  %v541_v43 = vsel %vm507_vm0, %v3496_v41, 0.0  ;;  %v597_v48 = vsel %vm507_vm0, %v3454_v29, -inf  ;;  %v3518_v49 = vld [vmem:[%s4145_s0 + $0x60] sm:$0xff]  ;;  %v603_v53 = vsel %vm507_vm0, %v3482_v37, -inf  ;;  %v579_v54 = vsel %vm507_vm0, %v3487_v38, -inf }
  0x62   :  { %539 = vadd.xlane.f32.xlu1 %v538_v39  ;;  %v517_v44 = vsel %vm507_vm0, %v3501_v42, 0.0  ;;  %v3523_v50 = vld [vmem:[%s4145_s0 + $0x20] sm:$0xff]  ;;  %v544_v51 = vsel %vm507_vm0, %v3518_v49, 0.0  ;;  %v3536_v55 = vld [vmem:[%s4145_s0 + $0x68] sm:$0xff]  ;;  %v606_v59 = vsel %vm507_vm0, %v3496_v41, -inf  ;;  %v582_v60 = vsel %vm507_vm0, %v3501_v42, -inf }
  0x63   :  { %515 = vadd.xlane.f32.xlu0 %v514_v40  ;;  %v520_v52 = vsel %vm507_vm0, %v3523_v50, 0.0  ;;  %v3541_v56 = vld [vmem:[%s4145_s0 + $0x28] sm:$0xff]  ;;  %v547_v57 = vsel %vm507_vm0, %v3536_v55, 0.0  ;;  %v3554_v32 = vld [vmem:[%s4145_s0 + $0x70] sm:$0xff]  ;;  %v609_v39 = vsel %vm507_vm0, %v3518_v49, -inf  ;;  %v585_v40 = vsel %vm507_vm0, %v3523_v50, -inf }
  0x64   :  { %v523_v58 = vsel %vm507_vm0, %v3541_v56, 0.0  ;;  %v3559_v33 = vld [vmem:[%s4145_s0 + $0x30] sm:$0xff]  ;;  %v550_v35 = vsel %vm507_vm0, %v3554_v32, 0.0  ;;  %vm3025_vm1 = vmmov 0   ;;  %v638_v12 = vand.u32 127, %v637_v20 }
  0x65   :  { %v526_v36 = vsel %vm507_vm0, %v3559_v33, 0.0  ;;  %v3640_v19 = vshrl.u32 %v637_v20, 7  ;;  %vm648_vm2 = vcmask 130112   ;;  %vm655_vm3 = vcmask 195712  }
  0x66   :  { %542 = vadd.xlane.f32.xlu1 %v541_v43  ;;  %v3572_v43 = vld [vmem:[%s4145_s0 + $0x78] sm:$0xff]  ;;  %v643_v3 = vadd.s32 4294967288, %v638_v12  ;;  %v650_v18 = vadd.s32 4294967280, %v638_v12  ;;  %v657_v2 = vadd.s32 4294967272, %v638_v12  ;;  %v664_v16 = vadd.s32 4294967264, %v638_v12 }
  0x67   :  { %518 = vadd.xlane.f32.xlu0 %v517_v44  ;;  %v3577_v44 = vld [vmem:[%s4145_s0 + $0x38] sm:$0xff]  ;;  %v3647_v26 = vsub.s32 %v638_v12, %v3640_v19  ;;  %v671_v0 = vadd.s32 4294967256, %v638_v12  ;;  %v685_v7 = vadd.s32 4294967240, %v638_v12  ;;  %vm662_vm4 = vcmask 261312  }
  0x68   :  { %v3650_v10 = vsub.s32 %v643_v3, %v3640_v19  ;;  %v3653_v20 = vsub.s32 %v650_v18, %v3640_v19  ;;  %v3656_v15 = vsub.s32 %v657_v2, %v3640_v19  ;;  %v678_v3 = vadd.s32 4294967248, %v638_v12 }
  0x69   :  { %vm669_vm5 = vcmask 326912   ;;  %v3668_v2 = vsub.s32 %v671_v0, %v3640_v19  ;;  %vm676_vm6 = vcmask 392512   ;;  %vm683_vm7 = vcmask 458112  }
  0x6a   :  { %577 = vmax.xlane.f32.xlu1 %v576_v45  ;;  %v553_v45 = vsel %vm507_vm0, %v3572_v43, 0.0  ;;  %vm690_vm8 = vcmask 523712   ;;  %vm731_vm9 = vcmask 1041409   ;;  %vm828_vm10 = vcmask 1043459  }
  0x6b   :  { %574 = vmax.xlane.f32.xlu0 %v573_v46  ;;  %v529_v46 = vsel %vm507_vm0, %v3577_v44, 0.0  ;;  %vm831_vm11 = vcmask 1041408   ;;  %vm920_vm12 = vcmask 1043456   ;;  %vm916_vm13 = vcmask 31744  }
  0x6c   :  { %vm1488_vm14 = vcmask 517120  }
  0x6e   :  { %601 = vmax.xlane.f32.xlu1 %v600_v47  ;;  %v612_v47 = vsel %vm507_vm0, %v3536_v55, -inf }
  0x6f   :  { %598 = vmax.xlane.f32.xlu0 %v597_v48  ;;  %v588_v48 = vsel %vm507_vm0, %v3541_v56, -inf }
  0x72   :  { %545 = vadd.xlane.f32.xlu1 %v544_v51  ;;  %v615_v51 = vsel %vm507_vm0, %v3554_v32, -inf }
  0x73   :  { %521 = vadd.xlane.f32.xlu0 %v520_v52  ;;  %v591_v52 = vsel %vm507_vm0, %v3559_v33, -inf }
  0x76   :  { %604 = vmax.xlane.f32.xlu1 %v603_v53  ;;  %v618_v53 = vsel %vm507_vm0, %v3572_v43, -inf }
  0x77   :  { %580 = vmax.xlane.f32.xlu0 %v579_v54  ;;  %v594_v54 = vsel %vm507_vm0, %v3577_v44, -inf }
  0x7a   :  { %548 = vadd.xlane.f32.xlu1 %v547_v57  ;;  %v833_v57 = vld [vmem:[%s4146_s1] sm:$0xff] }
  0x7b   :  { %524 = vadd.xlane.f32.xlu0 %v523_v58  ;;  %v834_v58 = vld [vmem:[%s4146_s1 + $0x8] sm:$0xff] }
  0x7e   :  { %607 = vmax.xlane.f32.xlu1 %v606_v59  ;;  %v2848_v59 = vpack.c.bf16 %v834_v58, %v833_v57 }
  0x7f   :  { %583 = vmax.xlane.f32.xlu0 %v582_v60  ;;  %v4157_v60 = vmov 0.0|0.0  }
  0x80   :  { %2847 = vmatprep.subr.bf16.mxu0 %v4157_v60 }
  0x81   :  { %2849 = vmatpush3.bf16.msra.mxu0 %v2848_v59 }
  0x82   :  { %551 = vadd.xlane.f32.xlu1 %v550_v35  ;;  %2850 = vmatprep.subr.bf16.mxu0 %v4157_v60  ;;  %v835_v35 = vld [vmem:[%s4146_s1 + $0x10] sm:$0xff] }
  0x83   :  { %527 = vadd.xlane.f32.xlu0 %v526_v36  ;;  %v836_v36 = vld [vmem:[%s4146_s1 + $0x18] sm:$0xff] }
  0x86   :  { %610 = vmax.xlane.f32.xlu1 %v609_v39  ;;  %v2851_v39 = vpack.c.bf16 %v836_v36, %v835_v35 }
  0x87   :  { %586 = vmax.xlane.f32.xlu0 %v585_v40  ;;  %v837_v40 = vld [vmem:[%s4146_s1 + $0x20] sm:$0xff] }
  0x88   :  { %2852 = vmatpush3.bf16.msra.mxu0 %v2851_v39 }
  0x89   :  { %2853 = vmatprep.subr.bf16.mxu0 %v4157_v60 }
  0x8a   :  { %554 = vadd.xlane.f32.xlu1 %v553_v45  ;;  %v838_v45 = vld [vmem:[%s4146_s1 + $0x28] sm:$0xff] }
  0x8b   :  { %530 = vadd.xlane.f32.xlu0 %v529_v46  ;;  %v2854_v46 = vpack.c.bf16 %v838_v45, %v837_v40 }
  0x8d   :  { %2855 = vmatpush3.bf16.msra.mxu0 %v2854_v46 }
  0x8e   :  { %613 = vmax.xlane.f32.xlu1 %v612_v47  ;;  %2856 = vmatprep.subr.bf16.mxu0 %v4157_v60  ;;  %v839_v47 = vld [vmem:[%s4146_s1 + $0x30] sm:$0xff] }
  0x8f   :  { %589 = vmax.xlane.f32.xlu0 %v588_v48  ;;  %v840_v48 = vld [vmem:[%s4146_s1 + $0x38] sm:$0xff] }
  0x92   :  { %616 = vmax.xlane.f32.xlu1 %v615_v51  ;;  %v2857_v51 = vpack.c.bf16 %v840_v48, %v839_v47 }
  0x93   :  { %592 = vmax.xlane.f32.xlu0 %v591_v52  ;;  %v4159_v52 = vmov 0.0  }
  0x94   :  { %2858 = vmatpush3.bf16.msra.mxu0 %v2857_v51  ;;  %2804 = vmatprep.mubr.msk.f32.mxu0 %vm3025_vm1, %v4159_v52 }
  0x95   :  { %2807 = vmatprep.subr.mxu1 %v4159_v52  ;;  %2809 = vmatprep.mubr.msk.f32.mxu1 %vm3025_vm1, %v4159_v52 }
  0x96   :  { %619 = vmax.xlane.f32.xlu1 %v618_v53 }
  0x97   :  { %595 = vmax.xlane.f32.xlu0 %v594_v54 }
  0xe7   :  { %v534_v53 = vpop.xlane.xlu1 %533 }
  0xe8   :  { %v510_v54 = vpop.xlane.xlu0 %509  ;;  %v565_v24 = vmul.f32 0.015625, %v534_v53  ;;  %v3665_v53 = vsub.s32 %v664_v16, %v3640_v19  ;;  %v3678_v16 = vsub.s32 %v685_v7, %v3640_v19 }
  0xe9   :  { %v557_v8 = vmul.f32 0.015625, %v510_v54 }
  0xea   :  { %v695_v12 = vrot.slane %v565_v24, %v3647_v26 }
  0xeb   :  { %v537_v57 = vpop.xlane.xlu1 %536 }
  0xec   :  { %v513_v58 = vpop.xlane.xlu0 %512  ;;  %v566_v17 = vmul.f32 0.015625, %v537_v57 }
  0xed   :  { %v558_v1 = vmul.f32 0.015625, %v513_v58 }
  0xee   :  { %v699_v57 = vrot.slane %v566_v17, %v3650_v10  ;;  %v642_v17 = vrot.slane %v557_v8, %v3647_v26 }
  0xef   :  { %v540_v59 = vpop.xlane.xlu1 %539  ;;  %v647_v58 = vrot.slane %v558_v1, %v3650_v10 }
  0xf0   :  { %v516_v35 = vpop.xlane.xlu0 %515  ;;  %v567_v63 = vmul.f32 0.015625, %v540_v59  ;;  %v700_v0 = vsel %vm648_vm2, %v699_v57, %v695_v12 }
  0xf1   :  { %v559_v23 = vmul.f32 0.015625, %v516_v35 }
  0xf2   :  { %v704_v59 = vrot.slane %v567_v63, %v3653_v20 }
  0xf3   :  { %v543_v36 = vpop.xlane.xlu1 %542  ;;  %v654_v35 = vrot.slane %v559_v23, %v3653_v20 }
  0xf4   :  { %v519_v39 = vpop.xlane.xlu0 %518  ;;  %v568_v14 = vmul.f32 0.015625, %v543_v36  ;;  %v3675_v36 = vsub.s32 %v678_v3, %v3640_v19  ;;  %v705_v12 = vsel %vm655_vm3, %v704_v59, %v700_v0 }
  0xf5   :  { %v560_v62 = vmul.f32 0.015625, %v519_v39  ;;  %v649_v39 = vsel %vm648_vm2, %v647_v58, %v642_v17 }
  0xf6   :  { %v709_v24 = vrot.slane %v568_v14, %v3656_v15 }
  0xf7   :  { %v3628_v40 = vpop.xlane.xlu1 %577  ;;  %v661_v8 = vrot.slane %v560_v62, %v3656_v15 }
  0xf8   :  { %v3630_v45 = vpop.xlane.xlu0 %574  ;;  %v757_v23 = vrot.slane %v3628_v40, %v3650_v10  ;;  %v656_v40 = vsel %vm655_vm3, %v654_v35, %v649_v39 }
  0xfb   :  { %v3632_v46 = vpop.xlane.xlu1 %601 }
  0xfc   :  { %v3634_v47 = vpop.xlane.xlu0 %598  ;;  %v796_v7 = vrot.slane %v3632_v46, %v3650_v10  ;;  %v663_v46 = vsel %vm662_vm4, %v661_v8, %v656_v40 }
  0xfd   :  { %v792_v3 = vrot.slane %v3634_v47, %v3647_v26 }
  0xff   :  { %v546_v48 = vpop.xlane.xlu1 %545 }
 0x100   :  { %v522_v51 = vpop.xlane.xlu0 %521  ;;  %v569_v54 = vmul.f32 0.015625, %v546_v48 }
 0x101   :  { %v561_v1 = vmul.f32 0.015625, %v522_v51  ;;  %v753_v51 = vrot.slane %v3630_v45, %v3647_v26  ;;  %v710_v45 = vsel %vm662_vm4, %v709_v24, %v705_v12 }
 0x102   :  { %v714_v14 = vrot.slane %v569_v54, %v3665_v53 }
 0x103   :  { %v3636_v60 = vpop.xlane.xlu1 %604  ;;  %v668_v62 = vrot.slane %v561_v1, %v3665_v53  ;;  %v758_v54 = vsel %vm648_vm2, %v757_v23, %v753_v51  ;;  %v797_v1 = vsel %vm648_vm2, %v796_v7, %v792_v3 }
 0x104   :  { %v3638_v52 = vpop.xlane.xlu0 %580 }
 0x107   :  { %v549_v4 = vpop.xlane.xlu1 %548 }
 0x108   :  { %v525_v28 = vpop.xlane.xlu0 %524  ;;  %v570_v57 = vmul.f32 0.015625, %v549_v4  ;;  %v801_v4 = vrot.slane %v3636_v60, %v3653_v20 }
 0x109   :  { %v562_v58 = vmul.f32 0.015625, %v525_v28  ;;  %v762_v28 = vrot.slane %v3638_v52, %v3653_v20 }
 0x10a   :  { %v719_v59 = vrot.slane %v570_v57, %v3668_v2 }
 0x10b   :  { %v3642_v27 = vpop.xlane.xlu1 %607  ;;  %v675_v35 = vrot.slane %v562_v58, %v3668_v2 }
 0x10c   :  { %v3644_v11 = vpop.xlane.xlu0 %583  ;;  %v806_v0 = vrot.slane %v3642_v27, %v3656_v15  ;;  %v802_v27 = vsel %vm655_vm3, %v801_v4, %v797_v1 }
 0x10d   :  { %v767_v39 = vrot.slane %v3644_v11, %v3656_v15  ;;  %v763_v11 = vsel %vm655_vm3, %v762_v28, %v758_v54 }
 0x10f   :  { %v552_v25 = vpop.xlane.xlu1 %551 }
 0x110   :  { %v528_v9 = vpop.xlane.xlu0 %527  ;;  %v571_v17 = vmul.f32 0.015625, %v552_v25  ;;  %v670_v25 = vsel %vm669_vm5, %v668_v62, %v663_v46 }
 0x111   :  { %v563_v6 = vmul.f32 0.015625, %v528_v9  ;;  %v715_v9 = vsel %vm669_vm5, %v714_v14, %v710_v45  ;;  %v768_v14 = vsel %vm662_vm4, %v767_v39, %v763_v11  ;;  %v915_v39 = vld [vmem:[#allocation6] sm:$0xf] }
 0x112   :  { %v724_v60 = vrot.slane %v571_v17, %v3675_v36  ;;  %v720_v3 = vsel %vm676_vm6, %v719_v59, %v715_v9  ;;  %2808 = vmatpush3.msk.msra.mxu1 %vm920_vm12, %v915_v39 }
 0x113   :  { %v3660_v18 = vpop.xlane.xlu1 %610  ;;  %v682_v52 = vrot.slane %v563_v6, %v3675_v36 }
 0x114   :  { %v3662_v22 = vpop.xlane.xlu0 %586  ;;  %v811_v24 = vrot.slane %v3660_v18, %v3665_v53  ;;  %v677_v18 = vsel %vm676_vm6, %v675_v35, %v670_v25  ;;  %v725_v62 = vsel %vm683_vm7, %v724_v60, %v720_v3  ;;  %v4191_v60 = vmov 0.0|0.0  }
 0x115   :  { %v772_v8 = vrot.slane %v3662_v22, %v3665_v53  ;;  %v684_v57 = vsel %vm683_vm7, %v682_v52, %v677_v18  ;;  %2859 = vmatprep.subr.bf16.mxu1 %v4191_v60  ;;  %v3751_v3 = vsub.s32 0, %v3640_v19 }
 0x117   :  { %v555_v48 = vpop.xlane.xlu1 %554 }
 0x118   :  { %v531_v63 = vpop.xlane.xlu0 %530  ;;  %v572_v13 = vmul.f32 0.015625, %v555_v48 }
 0x119   :  { %v564_v61 = vmul.f32 0.015625, %v531_v63 }
 0x11a   :  { %v729_v48 = vrot.slane %v572_v13, %v3678_v16 }
 0x11b   :  { %v614_v47 = vpop.xlane.xlu1 %613  ;;  %v689_v63 = vrot.slane %v564_v61, %v3678_v16  ;;  %v807_v61 = vsel %vm662_vm4, %v806_v0, %v802_v27 }
 0x11c   :  { %v590_v21 = vpop.xlane.xlu0 %589  ;;  %v816_v7 = vrot.slane %v614_v47, %v3668_v2  ;;  %v812_v58 = vsel %vm669_vm5, %v811_v24, %v807_v61  ;;  %v730_v12 = vsel %vm690_vm8, %v729_v48, %v725_v62  ;;  %v4192_v48 = vmov 0.0   ;;  %v1188_v62 = vld [vmem:[%s4148_s3 + $0x8] sm:$0xff] }
 0x11d   :  { %v777_v6 = vrot.slane %v590_v21, %v3668_v2  ;;  %v773_v21 = vsel %vm669_vm5, %v772_v8, %v768_v14  ;;  %v691_v40 = vsel %vm690_vm8, %v689_v63, %v684_v57  ;;  %v1187_v14 = vld [vmem:[%s4148_s3] sm:$0xff]  ;;  %v1189_v57 = vld [vmem:[%s4148_s3 + $0x10] sm:$0xff] }
 0x11e   :  { %v817_v46 = vsel %vm676_vm6, %v816_v7, %v812_v58  ;;  %v732_v59 = vsel %vm731_vm9, %v730_v12, %v691_v40  ;;  %v2860_v58 = vpack.c.bf16 %v1188_v62, %v1187_v14  ;;  %v1191_v40 = vld [vmem:[%s4148_s3 + $0x20] sm:$0xff] }
 0x11f   :  { %v617_v23 = vpop.xlane.xlu1 %616  ;;  %v778_v47 = vsel %vm676_vm6, %v777_v6, %v773_v21  ;;  %v1190_v21 = vld [vmem:[%s4148_s3 + $0x18] sm:$0xff] }
 0x120   :  { %v593_v51 = vpop.xlane.xlu0 %592  ;;  %v821_v22 = vrot.slane %v617_v23, %v3675_v36  ;;  %v2863_v12 = vpack.c.bf16 %v1190_v21, %v1189_v57 }
 0x121   :  { %v782_v13 = vrot.slane %v593_v51, %v3675_v36 }
 0x122   :  { %v822_v4 = vsel %vm683_vm7, %v821_v22, %v817_v46  ;;  %v1193_v46 = vld [vmem:[%s4148_s3 + $0x30] sm:$0xff] }
 0x123   :  { %v620_v17 = vpop.xlane.xlu1 %619  ;;  %v783_v28 = vsel %vm683_vm7, %v782_v13, %v778_v47  ;;  %v3755_v13 = vsub.s32 1, %v3640_v19  ;;  %v1194_v47 = vld [vmem:[%s4148_s3 + $0x38] sm:$0xff] }
 0x124   :  { %v596_v45 = vpop.xlane.xlu0 %595  ;;  %v826_v54 = vrot.slane %v620_v17, %v3678_v16  ;;  %v1192_v17 = vld [vmem:[%s4148_s3 + $0x28] sm:$0xff] }
 0x125   :  { %v787_v1 = vrot.slane %v596_v45, %v3678_v16  ;;  %v2866_v45 = vpack.c.bf16 %v1192_v17, %v1191_v40 }
 0x126   :  { %v827_v9 = vsel %vm690_vm8, %v826_v54, %v822_v4  ;;  %v2869_v54 = vpack.c.bf16 %v1194_v47, %v1193_v46  ;;  %v1196_v4 = vld [vmem:[%s4148_s3 + $0x48] sm:$0xff] }
 0x127   :  { %v788_v25 = vsel %vm690_vm8, %v787_v1, %v783_v28  ;;  %v1195_v1 = vld [vmem:[%s4148_s3 + $0x40] sm:$0xff] }
 0x128   :  { %v829_v35 = vsel %vm828_vm10, %v827_v9, %v788_v25  ;;  %v2872_v28 = vpack.c.bf16 %v1196_v4, %v1195_v1  ;;  %v1197_v9 = vld [vmem:[%s4148_s3 + $0x50] sm:$0xff]  ;;  %v1198_v25 = vld [vmem:[%s4148_s3 + $0x58] sm:$0xff] }
 0x129   :  { %v832_v0 = vsel %vm831_vm11, %v732_v59, %v829_v35  ;;  %v2875_v59 = vpack.c.bf16 %v1198_v25, %v1197_v9  ;;  %v1199_v35 = vld [vmem:[%s4148_s3 + $0x60] sm:$0xff] }
 0x12a   :  { %2805 = vmatmul.mubr.msk.f32.vlgmr.msra.gmra.mrb[0].mxu0 %vm507_vm0, %v832_v0  ;;  %v1200_v0 = vld [vmem:[%s4148_s3 + $0x68] sm:$0xff] }
 0x12b   :  { %v2878_v39 = vpack.c.bf16 %v1200_v0, %v1199_v35 }
 0x1fd   :  { %v910_v52 = vpop.f32.mrb[0].mxu0 }
 0x1fe   :  { %v914_v24 = vmax.f32 %v910_v52, 0.0  ;;  %v2806_v8 = vpop.f32.mrb[1].mxu0  ;;  %v1201_v52 = vld [vmem:[%s4148_s3 + $0x70] sm:$0xff] }
 0x200   :  { %2810 = vmatmul.mubr.msk.f32.vlgmr.msra.gmra.mrb[0].mxu1 %vm916_vm13, %v914_v24  ;;  %v1202_v24 = vld [vmem:[%s4148_s3 + $0x78] sm:$0xff] }
 0x201   :  { %2844 = vmatprep.mubr.msk.f32.mxu1 %vm3025_vm1, %v4192_v48  ;;  %2861 = vmatpush3.bf16.msra.mxu1 %v2860_v58  ;;  %v2881_v8 = vpack.c.bf16 %v1202_v24, %v1201_v52 }
 0x202   :  { %2862 = vmatprep.subr.bf16.mxu1 %v4191_v60 }
 0x205   :  { %2864 = vmatpush3.bf16.msra.mxu1 %v2863_v12 }
 0x206   :  { %2865 = vmatprep.subr.bf16.mxu1 %v4191_v60 }
 0x209   :  { %2867 = vmatpush3.bf16.msra.mxu1 %v2866_v45 }
 0x20a   :  { %2868 = vmatprep.subr.bf16.mxu1 %v4191_v60 }
 0x20d   :  { %2870 = vmatpush3.bf16.msra.mxu1 %v2869_v54 }
 0x20e   :  { %2871 = vmatprep.subr.bf16.mxu1 %v4191_v60 }
 0x211   :  { %2873 = vmatpush3.bf16.msra.mxu1 %v2872_v28 }
 0x212   :  { %2874 = vmatprep.subr.bf16.mxu1 %v4191_v60 }
 0x215   :  { %2876 = vmatpush3.bf16.msra.mxu1 %v2875_v59 }
 0x216   :  { %2877 = vmatprep.subr.bf16.mxu1 %v4191_v60 }
 0x219   :  { %2879 = vmatpush3.bf16.msra.mxu1 %v2878_v39 }
 0x21a   :  { %2880 = vmatprep.subr.bf16.mxu1 %v4191_v60 }
 0x21d   :  { %2882 = vmatpush3.bf16.msra.mxu1 %v2881_v8 }
 0x2d3   :  { %v990_v63 = vpop.f32.mrb[0].mxu1 }
 0x2d4   :  { %v995_v23 = vrot.slane %v990_v63, 2  ;;  %v2811_v51 = vpop.f32.mrb[1].mxu1 }
 0x2d6   :  { %v997_v27 = vadd.f32 %v995_v23, %v990_v63 }
 0x2d8   :  { %v2706_v11 = vmul.f32 -1.442695, %v997_v27 }
 0x2da   :  { %2928 = vpow2.f32 %v2706_v11 }
 0x2e4   :  { %v2929_v7 = vpop.eup %2928 }
 0x2e5   :  { %v1001_v6 = vadd.f32 1.0, %v2929_v7 }
 0x2e7   :  { %2930 = vrcp.f32 %v1001_v6 }
 0x2f1   :  { %v2931_v18 = vpop.eup %2930 }
 0x2f2   :  { %v1007_v22 = vrot.slane %v2931_v18, %v3751_v3  ;;  %v1042_v61 = vrot.slane %v2931_v18, %v3755_v13 }
 0x2f4   :  { %1013 = vbcast.lane.b32.xlu1 %v1007_v22, 264  ;;  %1009 = vbcast.lane.b32.xlu0 %v1007_v22, 256 }
 0x2f8   :  { %1017 = vbcast.lane.b32.xlu1 %v1007_v22, 272  ;;  %1044 = vbcast.lane.b32.xlu0 %v1042_v61, 256 }
 0x2fc   :  { %1021 = vbcast.lane.b32.xlu1 %v1007_v22, 280  ;;  %1052 = vbcast.lane.b32.xlu0 %v1042_v61, 272 }
 0x300   :  { %1048 = vbcast.lane.b32.xlu1 %v1042_v61, 264  ;;  %1025 = vbcast.lane.b32.xlu0 %v1007_v22, 288 }
 0x304   :  { %1056 = vbcast.lane.b32.xlu1 %v1042_v61, 280  ;;  %1060 = vbcast.lane.b32.xlu0 %v1042_v61, 288 }
 0x308   :  { %1029 = vbcast.lane.b32.xlu1 %v1007_v22, 296  ;;  %1033 = vbcast.lane.b32.xlu0 %v1007_v22, 304 }
 0x30c   :  { %1064 = vbcast.lane.b32.xlu1 %v1042_v61, 296  ;;  %1068 = vbcast.lane.b32.xlu0 %v1042_v61, 304 }
 0x310   :  { %1037 = vbcast.lane.b32.xlu1 %v1007_v22, 312 }
 0x314   :  { %1072 = vbcast.lane.b32.xlu1 %v1042_v61, 312 }
 0x366   :  { %v1014_v48 = vpop.permute.xlu1 %1013  ;;  %v1010_v63 = vpop.permute.xlu0 %1009 }
 0x367   :  { %v3820_v60 = vmul.f32 %v1014_v48, %v3473_v34  ;;  %v3823_v58 = vmul.f32 %v1010_v63, %v3459_v30 }
 0x36a   :  { %v1018_v23 = vpop.permute.xlu1 %1017  ;;  %v1045_v51 = vpop.permute.xlu0 %1044 }
 0x36b   :  { %v3814_v62 = vmul.f32 %v1018_v23, %v3487_v38 }
 0x36e   :  { %v1022_v27 = vpop.permute.xlu1 %1021  ;;  %v1053_v11 = vpop.permute.xlu0 %1052 }
 0x36f   :  { %v3817_v57 = vmul.f32 %v1022_v27, %v3501_v42  ;;  %v3832_v40 = vmul.f32 %v1053_v11, %v3482_v37  ;;  %v1136_v42 = vsel %vm507_vm0, %v3814_v62, -inf  ;;  %v1134_v37 = vsel %vm507_vm0, %v3823_v58, -inf }
 0x370   :  { %v1137_v1 = vmax.f32 %v1134_v37, %v1136_v42 }
 0x371   :  { %v1138_v34 = vsel %vm507_vm0, %v3817_v57, -inf }
 0x372   :  { %v1049_v7 = vpop.permute.xlu1 %1048  ;;  %v1026_v6 = vpop.permute.xlu0 %1025 }
 0x373   :  { %v3826_v21 = vmul.f32 %v1026_v6, %v3523_v50  ;;  %v1135_v50 = vsel %vm507_vm0, %v3820_v60, -inf  ;;  %v3852_v45 = vmul.f32 %v1049_v7, %v3464_v31 }
 0x374   :  { %v1139_v4 = vmax.f32 %v1135_v50, %v1138_v34 }
 0x375   :  { %v1156_v0 = vsel %vm507_vm0, %v3852_v45, -inf }
 0x376   :  { %v1057_v18 = vpop.permute.xlu1 %1056  ;;  %v1061_v22 = vpop.permute.xlu0 %1060 }
 0x377   :  { %v3839_v17 = vmul.f32 %v1057_v18, %v3496_v41  ;;  %v1140_v41 = vsel %vm507_vm0, %v3826_v21, -inf  ;;  %v3857_v47 = vmul.f32 %v1061_v22, %v3518_v49 }
 0x378   :  { %v1141_v59 = vmax.f32 %v1137_v1, %v1140_v41 }
 0x379   :  { %v1159_v28 = vsel %vm507_vm0, %v3839_v17, -inf  ;;  %v1161_v39 = vsel %vm507_vm0, %v3857_v47, -inf }
 0x37a   :  { %v1030_v61 = vpop.permute.xlu1 %1029  ;;  %v1034_v14 = vpop.permute.xlu0 %1033 }
 0x37b   :  { %v3829_v12 = vmul.f32 %v1030_v61, %v3541_v56  ;;  %v3842_v30 = vmul.f32 %v1034_v14, %v3559_v33  ;;  %v3849_v56 = vmul.f32 %v1045_v51, %v3454_v29  ;;  %v1157_v29 = vsel %vm507_vm0, %v3832_v40, -inf }
 0x37d   :  { %v1142_v33 = vsel %vm507_vm0, %v3829_v12, -inf  ;;  %v1144_v9 = vsel %vm507_vm0, %v3842_v30, -inf }
 0x37e   :  { %v1065_v38 = vpop.permute.xlu1 %1064  ;;  %v1069_v46 = vpop.permute.xlu0 %1068  ;;  %v1143_v35 = vmax.f32 %v1139_v4, %v1142_v33  ;;  %v1145_v8 = vmax.f32 %v1141_v59, %v1144_v9 }
 0x37f   :  { %v3862_v54 = vmul.f32 %v1065_v38, %v3536_v55  ;;  %v3871_v49 = vmul.f32 %v1069_v46, %v3554_v32  ;;  %v1155_v55 = vsel %vm507_vm0, %v3849_v56, -inf }
 0x380   :  { %v1158_v24 = vmax.f32 %v1155_v55, %v1157_v29  ;;  %v1114_v55 = vsel %vm507_vm0, %v3832_v40, 0.0 }
 0x381   :  { %v1163_v52 = vsel %vm507_vm0, %v3862_v54, -inf  ;;  %v1165_v23 = vsel %vm507_vm0, %v3871_v49, -inf }
 0x382   :  { %v1038_v31 = vpop.permute.xlu1 %1037  ;;  %v1162_v27 = vmax.f32 %v1158_v24, %v1161_v39  ;;  %v1116_v39 = vsel %vm507_vm0, %v3839_v17, 0.0 }
 0x383   :  { %v3874_v25 = vmul.f32 %v1038_v31, %v3577_v44  ;;  %v1160_v44 = vmax.f32 %v1156_v0, %v1159_v28  ;;  %v1112_v31 = vsel %vm507_vm0, %v3852_v45, 0.0  ;;  %v1111_v28 = vsel %vm507_vm0, %v3849_v56, 0.0 }
 0x384   :  { %v1166_v18 = vmax.f32 %v1162_v27, %v1165_v23  ;;  %v1113_v9 = vadd.f32 %v1112_v31, %v1111_v28  ;;  %v1090_v0 = vsel %vm507_vm0, %v3823_v58, 0.0  ;;  %v1120_v23 = vsel %vm507_vm0, %v3862_v54, 0.0 }
 0x385   :  { %v1146_v32 = vsel %vm507_vm0, %v3874_v25, -inf  ;;  %v1164_v11 = vmax.f32 %v1160_v44, %v1163_v52  ;;  %v1093_v52 = vsel %vm507_vm0, %v3814_v62, 0.0  ;;  %v1095_v44 = vsel %vm507_vm0, %v3817_v57, 0.0 }
 0x386   :  { %v1147_v48 = vmax.f32 %v1143_v35, %v1146_v32  ;;  %v1073_v63 = vpop.permute.xlu1 %1072  ;;  %v1115_v59 = vadd.f32 %v1114_v55, %v1113_v9  ;;  %v1091_v35 = vsel %vm507_vm0, %v3820_v60, 0.0 }
 0x387   :  { %v3889_v51 = vmul.f32 %v1073_v63, %v3572_v43  ;;  %v1092_v32 = vadd.f32 %v1091_v35, %v1090_v0  ;;  %v1118_v63 = vsel %vm507_vm0, %v3857_v47, 0.0 }
 0x388   :  { %v1148_v7 = vmax.f32 %v1145_v8, %v1147_v48  ;;  %v1117_v24 = vadd.f32 %v1116_v39, %v1115_v59  ;;  %v1097_v48 = vsel %vm507_vm0, %v3826_v21, 0.0 }
 0x389   :  { %v1167_v6 = vsel %vm507_vm0, %v3889_v51, -inf  ;;  %v1094_v8 = vadd.f32 %v1093_v52, %v1092_v32 }
 0x38a   :  { %v1149_v22 = vrot.slane %v1148_v7, 4  ;;  %v1168_v61 = vmax.f32 %v1164_v11, %v1167_v6  ;;  %v1119_v11 = vadd.f32 %v1118_v63, %v1117_v24 }
 0x38b   :  { %v1096_v27 = vadd.f32 %v1095_v44, %v1094_v8 }
 0x38c   :  { %v1169_v14 = vmax.f32 %v1166_v18, %v1168_v61  ;;  %v1150_v38 = vmax.f32 %v1148_v7, %v1149_v22  ;;  %v1099_v7 = vsel %vm507_vm0, %v3829_v12, 0.0  ;;  %v1121_v18 = vadd.f32 %v1120_v23, %v1119_v11 }
 0x38d   :  { %v1098_v6 = vadd.f32 %v1097_v48, %v1096_v27  ;;  %v1122_v61 = vsel %vm507_vm0, %v3871_v49, 0.0  ;;  %v3027_v27 = vmov 1966171168  }
 0x38e   :  { %v1170_v42 = vrot.slane %v1169_v14, 4  ;;  %v1151_v34 = vrot.slane %v1150_v38, 2  ;;  %v1281_v11 = vunpack.c.l.s4 %v3027_v27 }
 0x38f   :  { %v1100_v22 = vadd.f32 %v1099_v7, %v1098_v6 }
 0x390   :  { %v1152_v50 = vmax.f32 %v1150_v38, %v1151_v34  ;;  %v1171_v37 = vmax.f32 %v1169_v14, %v1170_v42  ;;  %v1124_v14 = vsel %vm507_vm0, %v3889_v51, 0.0  ;;  %v1123_v38 = vadd.f32 %v1122_v61, %v1121_v18 }
 0x391   :  { %v1101_v42 = vsel %vm507_vm0, %v3842_v30, 0.0  ;;  %v1103_v34 = vsel %vm507_vm0, %v3874_v25, 0.0  ;;  %v1282_v7 = vunpack.c.0.s8 %v1281_v11 }
 0x392   :  { %v1172_v46 = vrot.slane %v1171_v37, 2  ;;  %v1153_v41 = vrot.slane %v1152_v50, 1 }
 0x393   :  { %v1285_v6 = vsub.s32 %v1282_v7, %v3640_v19 }
 0x394   :  { %v1173_v33 = vmax.f32 %v1171_v37, %v1172_v46  ;;  %v1154_v1 = vmax.f32 %v1152_v50, %v1153_v41  ;;  %v1102_v50 = vadd.f32 %v1101_v42, %v1100_v22  ;;  %v1125_v37 = vadd.f32 %v1124_v14, %v1123_v38 }
 0x396   :  { %v1174_v43 = vrot.slane %v1173_v33, 1  ;;  %v1104_v46 = vadd.f32 %v1103_v34, %v1102_v50  ;;  %v1126_v41 = vrot.slane %v1125_v37, 4 }
 0x398   :  { %v1175_v4 = vmax.f32 %v1173_v33, %v1174_v43  ;;  %v1105_v33 = vrot.slane %v1104_v46, 4  ;;  %v1127_v43 = vadd.f32 %v1126_v41, %v1125_v37 }
 0x39a   :  { %v1182_v29 = vsel %vm731_vm9, %v1175_v4, %v1154_v1  ;;  %v1106_v1 = vadd.f32 %v1105_v33, %v1104_v46  ;;  %v1128_v4 = vrot.slane %v1127_v43, 2 }
 0x39b   :  { %1183 = vrot.lane.b32.xlu0 %v1182_v29, %s3018_s17 }
 0x39c   :  { %v1107_v29 = vrot.slane %v1106_v1, 2  ;;  %v1129_v31 = vadd.f32 %v1128_v4, %v1127_v43 }
 0x39e   :  { %v1108_v28 = vadd.f32 %v1107_v29, %v1106_v1  ;;  %v1130_v9 = vrot.slane %v1129_v31, 1 }
 0x3a0   :  { %v1109_v55 = vrot.slane %v1108_v28, 1  ;;  %v1131_v59 = vadd.f32 %v1130_v9, %v1129_v31 }
 0x3a2   :  { %v1110_v35 = vadd.f32 %v1109_v55, %v1108_v28  ;;  %v1133_v0 = vmul.f32 0.015625, %v1131_v59 }
 0x3a4   :  { %v1132_v39 = vmul.f32 0.015625, %v1110_v35 }
 0x3a6   :  { %v1178_v32 = vsel %vm731_vm9, %v1133_v0, %v1132_v39 }
 0x40d   :  { %v1184_v52 = vpop.permute.xlu0 %1183 }
 0x40e   :  { %v1186_v24 = vsel %vm507_vm0, %v1178_v32, %v1184_v52 }
 0x40f   :  { %2845 = vmatmul.mubr.f32.vlgmr.msra.gmra.mrb[2].mxu1 %v1186_v24 }
 0x4e2   :  { %v1269_v44 = vpop.f32.mrb[2].mxu1 }
 0x4e3   :  { %v2707_v8 = vmul.f32 -1.442695, %v1269_v44  ;;  %v2846_v48 = vpop.f32.mrb[3].mxu1 }
 0x4e5   :  { %2932 = vpow2.f32 %v2707_v8 }
 0x4ef   :  { %v2933_v63 = vpop.eup %2932 }
 0x4f0   :  { %v1276_v23 = vadd.f32 1.0, %v2933_v63 }
 0x4f2   :  { %2934 = vrcp.f32 %v1276_v23 }
 0x4fc   :  { %v2935_v18 = vpop.eup %2934 }
 0x4fd   :  { %v1286_v22 = vrot.slane %v2935_v18, %v1285_v6 }
 0x4ff   :  { %v1287_v61 = vcombine.high %v1286_v22, %v1286_v22  ;;  %v1294_v14 = vrot.slane %v1286_v22, %v1285_v6 }
 0x501   :  { %v1301_v38 = vrot.slane %v1287_v61, %v1285_v6  ;;  %v1305_v42 = vrot.slane %v1294_v14, %v3751_v3 }
 0x503   :  { %v1309_v34 = vrot.slane %v1301_v38, %v3751_v3  ;;  %v1313_v50 = vmul.f32 %v1305_v42, %v3820_v60  ;;  %v1312_v37 = vmul.f32 %v1305_v42, %v3823_v58  ;;  %v1314_v33 = vmul.f32 %v1305_v42, %v3814_v62 }
 0x504   :  { %v1315_v29 = vmul.f32 %v1305_v42, %v3817_v57  ;;  %v1316_v62 = vmul.f32 %v1305_v42, %v3826_v21  ;;  %v1317_v57 = vmul.f32 %v1305_v42, %v3829_v12  ;;  %v1318_v21 = vmul.f32 %v1305_v42, %v3842_v30 }
 0x505   :  { %v1331_v46 = vsel %vm507_vm0, %v1313_v50, 0.0  ;;  %v1328_v41 = vsel %vm507_vm0, %v1312_v37, 0.0  ;;  %v1320_v43 = vmul.f32 %v1309_v34, %v3849_v56  ;;  %v1334_v1 = vsel %vm507_vm0, %v1314_v33, 0.0 }
 0x506   :  { %1332 = vadd.xlane.f32.xlu0 %v1331_v46  ;;  %1329 = vadd.xlane.f32.xlu1 %v1328_v41  ;;  %v1321_v60 = vmul.f32 %v1309_v34, %v3852_v45  ;;  %v1337_v58 = vsel %vm507_vm0, %v1315_v29, 0.0  ;;  %v1322_v56 = vmul.f32 %v1309_v34, %v3832_v40  ;;  %v1340_v28 = vsel %vm507_vm0, %v1316_v62, 0.0 }
 0x507   :  { %v1352_v4 = vsel %vm507_vm0, %v1320_v43, 0.0  ;;  %v1323_v45 = vmul.f32 %v1309_v34, %v3839_v17  ;;  %v1343_v55 = vsel %vm507_vm0, %v1317_v57, 0.0  ;;  %v1324_v40 = vmul.f32 %v1309_v34, %v3857_v47 }
 0x508   :  { %v1355_v31 = vsel %vm507_vm0, %v1321_v60, 0.0  ;;  %v1358_v9 = vsel %vm507_vm0, %v1322_v56, 0.0  ;;  %v1346_v35 = vsel %vm507_vm0, %v1318_v21, 0.0  ;;  %v1319_v12 = vmul.f32 %v1305_v42, %v3874_v25 }
 0x509   :  { %v1361_v59 = vsel %vm507_vm0, %v1323_v45, 0.0  ;;  %v1364_v0 = vsel %vm507_vm0, %v1324_v40, 0.0  ;;  %v1325_v17 = vmul.f32 %v1309_v34, %v3862_v54  ;;  %v1326_v30 = vmul.f32 %v1309_v34, %v3871_v49 }
 0x50a   :  { %1335 = vadd.xlane.f32.xlu1 %v1334_v1  ;;  %1353 = vadd.xlane.f32.xlu0 %v1352_v4  ;;  %v1349_v39 = vsel %vm507_vm0, %v1319_v12, 0.0  ;;  %v1327_v32 = vmul.f32 %v1309_v34, %v3889_v51 }
 0x50b   :  { %v1367_v52 = vsel %vm507_vm0, %v1325_v17, 0.0  ;;  %v1370_v47 = vsel %vm507_vm0, %v1326_v30, 0.0 }
 0x50c   :  { %v1373_v24 = vsel %vm507_vm0, %v1327_v32, 0.0 }
 0x50e   :  { %1338 = vadd.xlane.f32.xlu1 %v1337_v58  ;;  %1356 = vadd.xlane.f32.xlu0 %v1355_v31 }
 0x512   :  { %1341 = vadd.xlane.f32.xlu1 %v1340_v28  ;;  %1359 = vadd.xlane.f32.xlu0 %v1358_v9 }
 0x516   :  { %1344 = vadd.xlane.f32.xlu1 %v1343_v55  ;;  %1362 = vadd.xlane.f32.xlu0 %v1361_v59 }
 0x51a   :  { %1347 = vadd.xlane.f32.xlu1 %v1346_v35  ;;  %1365 = vadd.xlane.f32.xlu0 %v1364_v0 }
 0x51e   :  { %1350 = vadd.xlane.f32.xlu1 %v1349_v39  ;;  %1368 = vadd.xlane.f32.xlu0 %v1367_v52 }
 0x522   :  { %1371 = vadd.xlane.f32.xlu0 %v1370_v47 }
 0x526   :  { %1374 = vadd.xlane.f32.xlu0 %v1373_v24 }
 0x593   :  { %v1333_v25 = vpop.xlane.xlu0 %1332  ;;  %v1330_v54 = vpop.xlane.xlu1 %1329 }
 0x594   :  { %v1377_v18 = vmul.f32 0.015625, %v1333_v25  ;;  %v1376_v22 = vmul.f32 0.015625, %v1330_v54 }
 0x596   :  { %v1415_v37 = vrot.slane %v1377_v18, %v3650_v10  ;;  %v1411_v43 = vrot.slane %v1376_v22, %v3647_v26 }
 0x597   :  { %v1336_v44 = vpop.xlane.xlu1 %1335  ;;  %v1354_v8 = vpop.xlane.xlu0 %1353 }
 0x598   :  { %v1378_v51 = vmul.f32 0.015625, %v1336_v44  ;;  %v1384_v14 = vmul.f32 0.015625, %v1354_v8  ;;  %v1416_v21 = vsel %vm648_vm2, %v1415_v37, %v1411_v43 }
 0x59a   :  { %v1420_v60 = vrot.slane %v1378_v51, %v3653_v20  ;;  %v1450_v58 = vrot.slane %v1384_v14, %v3647_v26 }
 0x59b   :  { %v1339_v48 = vpop.xlane.xlu1 %1338  ;;  %v1357_v63 = vpop.xlane.xlu0 %1356 }
 0x59c   :  { %v1385_v61 = vmul.f32 0.015625, %v1357_v63  ;;  %v1379_v34 = vmul.f32 0.015625, %v1339_v48  ;;  %v1421_v12 = vsel %vm655_vm3, %v1420_v60, %v1416_v21 }
 0x59e   :  { %v1454_v1 = vrot.slane %v1385_v61, %v3650_v10  ;;  %v1425_v28 = vrot.slane %v1379_v34, %v3656_v15 }
 0x59f   :  { %v1342_v23 = vpop.xlane.xlu1 %1341  ;;  %v1360_v27 = vpop.xlane.xlu0 %1359 }
 0x5a0   :  { %v1386_v38 = vmul.f32 0.015625, %v1360_v27  ;;  %v1380_v46 = vmul.f32 0.015625, %v1342_v23  ;;  %v1455_v40 = vsel %vm648_vm2, %v1454_v1, %v1450_v58  ;;  %v1426_v47 = vsel %vm662_vm4, %v1425_v28, %v1421_v12 }
 0x5a2   :  { %v1459_v31 = vrot.slane %v1386_v38, %v3653_v20  ;;  %v1430_v55 = vrot.slane %v1380_v46, %v3665_v53 }
 0x5a3   :  { %v1345_v11 = vpop.xlane.xlu1 %1344  ;;  %v1363_v49 = vpop.xlane.xlu0 %1362 }
 0x5a4   :  { %v1387_v50 = vmul.f32 0.015625, %v1363_v49  ;;  %v1381_v4 = vmul.f32 0.015625, %v1345_v11  ;;  %v1460_v17 = vsel %vm655_vm3, %v1459_v31, %v1455_v40  ;;  %v1431_v54 = vsel %vm669_vm5, %v1430_v55, %v1426_v47 }
 0x5a6   :  { %v1464_v9 = vrot.slane %v1387_v50, %v3656_v15  ;;  %v1435_v35 = vrot.slane %v1381_v4, %v3668_v2 }
 0x5a7   :  { %v1348_v7 = vpop.xlane.xlu1 %1347  ;;  %v1366_v6 = vpop.xlane.xlu0 %1365 }
 0x5a8   :  { %v1388_v41 = vmul.f32 0.015625, %v1366_v6  ;;  %v1382_v62 = vmul.f32 0.015625, %v1348_v7  ;;  %v1465_v32 = vsel %vm662_vm4, %v1464_v9, %v1460_v17  ;;  %v1436_v8 = vsel %vm676_vm6, %v1435_v35, %v1431_v54 }
 0x5aa   :  { %v1469_v59 = vrot.slane %v1388_v41, %v3665_v53  ;;  %v1440_v39 = vrot.slane %v1382_v62, %v3675_v36 }
 0x5ab   :  { %v1369_v42 = vpop.xlane.xlu0 %1368  ;;  %v1351_v33 = vpop.xlane.xlu1 %1350 }
 0x5ac   :  { %v1389_v29 = vmul.f32 0.015625, %v1369_v42  ;;  %v1383_v57 = vmul.f32 0.015625, %v1351_v33  ;;  %v1470_v44 = vsel %vm669_vm5, %v1469_v59, %v1465_v32  ;;  %v1441_v23 = vsel %vm683_vm7, %v1440_v39, %v1436_v8 }
 0x5ae   :  { %v1474_v0 = vrot.slane %v1389_v29, %v3668_v2  ;;  %v1445_v24 = vrot.slane %v1383_v57, %v3678_v16 }
 0x5af   :  { %v1372_v56 = vpop.xlane.xlu0 %1371 }
 0x5b0   :  { %v1390_v45 = vmul.f32 0.015625, %v1372_v56  ;;  %v1475_v48 = vsel %vm676_vm6, %v1474_v0, %v1470_v44  ;;  %v1446_v11 = vsel %vm690_vm8, %v1445_v24, %v1441_v23 }
 0x5b2   :  { %v1479_v52 = vrot.slane %v1390_v45, %v3675_v36 }
 0x5b3   :  { %v1375_v30 = vpop.xlane.xlu0 %1374 }
 0x5b4   :  { %v1391_v25 = vmul.f32 0.015625, %v1375_v30  ;;  %v1480_v27 = vsel %vm683_vm7, %v1479_v52, %v1475_v48 }
 0x5b6   :  { %v1484_v63 = vrot.slane %v1391_v25, %v3678_v16 }
 0x5b8   :  { %v1485_v49 = vsel %vm690_vm8, %v1484_v63, %v1480_v27 }
 0x5b9   :  { %v1486_v7 = vsel %vm731_vm9, %v1485_v49, %v1446_v11 }
 0x5ba   :  { %1489 = vst.msk [vmem:[#allocation10] sm:$0x3] %vm1488_vm14, %v1486_v7 }
 0x5bb   :  { %3004 = dma.done.wait [#allocation5], 4096 }
 0x5bc   :  { %3005 = vsyncadd [#allocation5], 4294963200  ;;  %v1494_v6 = vpack.c.bf16 %v1377_v18, %v1376_v22  ;;  %v1495_v42 = vpack.c.bf16 %v1379_v34, %v1378_v51  ;;  %v1496_v37 = vpack.c.bf16 %v1381_v4, %v1380_v46  ;;  %v3028_v33 = vmov 0   ;;  %v1510_v54 = vld [vmem:[#allocation2 + $0x40] sm:$0xff]  ;;  %v1507_v11 = vld [vmem:[#allocation2 + $0x28] sm:$0xff] }
 0x5bd   :  { %1715 = vmatprep.mubr.bf16.mxu0 %v3028_v33  ;;  %v1497_v43 = vpack.c.bf16 %v1383_v57, %v1382_v62  ;;  %v1498_v1 = vpack.c.bf16 %v1385_v61, %v1384_v14  ;;  %v1499_v60 = vpack.c.bf16 %v1387_v50, %v1386_v38  ;;  %v1500_v58 = vpack.c.bf16 %v1389_v29, %v1388_v41  ;;  %v1503_v41 = vld [vmem:[#allocation2 + $0x8] sm:$0xff]  ;;  %v1502_v29 = vld [vmem:[#allocation2] sm:$0xff] }
 0x5be   :  { %v1501_v31 = vpack.c.bf16 %v1391_v25, %v1390_v45  ;;  %v1584_v56 = vunpack.c.l.b16 %v1494_v6  ;;  %v1585_v28 = vunpack.c.h.b16 %v1494_v6  ;;  %v1586_v9 = vunpack.c.l.b16 %v1495_v42  ;;  %1797 = vmatprep.mubr.bf16.mxu1 %v3028_v33  ;;  %v1511_v57 = vld [vmem:[#allocation2 + $0x48] sm:$0xff]  ;;  %1683 = vmatprep.subr.bf16.mxu0 %v1503_v41  ;;  %v1506_v49 = vld [vmem:[#allocation2 + $0x20] sm:$0xff]  ;;  %v1524_v41 = vld [vmem:[#allocation2 + $0xb0] sm:$0xff] }
 0x5bf   :  { %v1587_v55 = vunpack.c.h.b16 %v1495_v42  ;;  %v1588_v59 = vunpack.c.l.b16 %v1496_v37  ;;  %v1589_v21 = vunpack.c.h.b16 %v1496_v37  ;;  %v1590_v40 = vunpack.c.l.b16 %v1497_v43  ;;  %1684 = vmatpush1.bf16.msra.mxu0 %v1502_v29  ;;  %1765 = vmatprep.subr.bf16.mxu1 %v1507_v11  ;;  %v1515_v6 = vld [vmem:[#allocation2 + $0x68] sm:$0xff]  ;;  %v1518_v42 = vld [vmem:[#allocation2 + $0x80] sm:$0xff]  ;;  %v1533_v29 = vld [vmem:[#allocation2 + $0xf8] sm:$0xff] }
 0x5c0   :  { %v1591_v18 = vunpack.c.h.b16 %v1497_v43  ;;  %v1592_v22 = vunpack.c.l.b16 %v1498_v1  ;;  %v1593_v51 = vunpack.c.h.b16 %v1498_v1  ;;  %v1594_v34 = vunpack.c.l.b16 %v1499_v60  ;;  %1685 = vmatprep.subr.bf16.mxu0 %v1511_v57  ;;  %1766 = vmatpush1.bf16.msra.mxu1 %v1506_v49  ;;  %v1527_v43 = vld [vmem:[#allocation2 + $0xc8] sm:$0xff]  ;;  %v1532_v57 = vld [vmem:[#allocation2 + $0xf0] sm:$0xff] }
 0x5c1   :  { %v1595_v46 = vunpack.c.h.b16 %v1499_v60  ;;  %v1596_v4 = vunpack.c.l.b16 %v1500_v58  ;;  %v1597_v62 = vunpack.c.h.b16 %v1500_v58  ;;  %v1598_v61 = vunpack.c.l.b16 %v1501_v31  ;;  %1767 = vmatprep.subr.bf16.mxu1 %v1515_v6  ;;  %v1523_v58 = vld [vmem:[#allocation2 + $0xa8] sm:$0xff] }
 0x5c2   :  { %v1603_v14 = vrot.slane %v1584_v56, %v3647_v26  ;;  %v1607_v38 = vrot.slane %v1585_v28, %v3650_v10  ;;  %v1612_v50 = vrot.slane %v1586_v9, %v3653_v20  ;;  %v1599_v45 = vunpack.c.h.b16 %v1501_v31  ;;  %v1526_v56 = vld [vmem:[#allocation2 + $0xc0] sm:$0xff]  ;;  %v1505_v28 = vld [vmem:[#allocation2 + $0x18] sm:$0xff] }
 0x5c3   :  { %v1617_v35 = vrot.slane %v1587_v55, %v3656_v15  ;;  %v1622_v0 = vrot.slane %v1588_v59, %v3665_v53  ;;  %v1627_v12 = vrot.slane %v1589_v21, %v3668_v2  ;;  %v1632_v39 = vrot.slane %v1590_v40, %v3675_v36  ;;  %1686 = vmatpush1.bf16.msra.mxu0 %v1510_v54  ;;  %v1522_v9 = vld [vmem:[#allocation2 + $0xa0] sm:$0xff]  ;;  %v1531_v59 = vld [vmem:[#allocation2 + $0xe8] sm:$0xff]  ;;  %v1504_v21 = vld [vmem:[#allocation2 + $0x10] sm:$0xff] }
 0x5c4   :  { %v1608_v17 = vsel %vm648_vm2, %v1607_v38, %v1603_v14  ;;  %v1642_v52 = vrot.slane %v1592_v22, %v3647_v26  ;;  %v1646_v30 = vrot.slane %v1593_v51, %v3650_v10  ;;  %v1651_v32 = vrot.slane %v1594_v34, %v3653_v20  ;;  %v1519_v10 = vld [vmem:[#allocation2 + $0x88] sm:$0xff]  ;;  %v1513_v40 = vld [vmem:[#allocation2 + $0x58] sm:$0xff]  ;;  %v1512_v22 = vld [vmem:[#allocation2 + $0x50] sm:$0xff] }
 0x5c5   :  { %v1613_v47 = vsel %vm655_vm3, %v1612_v50, %v1608_v17  ;;  %v1656_v24 = vrot.slane %v1595_v46, %v3656_v15  ;;  %v1661_v25 = vrot.slane %v1596_v4, %v3665_v53  ;;  %v1637_v8 = vrot.slane %v1591_v18, %v3678_v16  ;;  %1687 = vmatprep.subr.bf16.mxu0 %v1519_v10  ;;  %v1530_v18 = vld [vmem:[#allocation2 + $0xe0] sm:$0xff]  ;;  %v1521_v51 = vld [vmem:[#allocation2 + $0x98] sm:$0xff]  ;;  %v1520_v34 = vld [vmem:[#allocation2 + $0x90] sm:$0xff] }
 0x5c6   :  { %v1618_v44 = vsel %vm662_vm4, %v1617_v35, %v1613_v47  ;;  %v1647_v48 = vsel %vm648_vm2, %v1646_v30, %v1642_v52  ;;  %v1666_v26 = vrot.slane %v1597_v62, %v3668_v2  ;;  %v1671_v20 = vrot.slane %v1598_v61, %v3675_v36  ;;  %v1529_v46 = vld [vmem:[#allocation2 + $0xd8] sm:$0xff]  ;;  %v1528_v4 = vld [vmem:[#allocation2 + $0xd0] sm:$0xff] }
 0x5c7   :  { %v1623_v63 = vsel %vm669_vm5, %v1622_v0, %v1618_v44  ;;  %v1652_v23 = vsel %vm655_vm3, %v1651_v32, %v1647_v48  ;;  %v1676_v27 = vrot.slane %v1599_v45, %v3678_v16  ;;  %v1514_v16 = vld [vmem:[#allocation2 + $0x60] sm:$0xff]  ;;  %1688 = vmatpush1.bf16.msra.mxu0 %v1518_v42  ;;  %v1509_v62 = vld [vmem:[#allocation2 + $0x38] sm:$0xff]  ;;  %v1508_v61 = vld [vmem:[#allocation2 + $0x30] sm:$0xff]  ;;  %v1554_v0 = vsub.s32 4, %v3640_v19 }
 0x5c8   :  { %v1628_v15 = vsel %vm676_vm6, %v1627_v12, %v1623_v63  ;;  %v1657_v53 = vsel %vm662_vm4, %v1656_v24, %v1652_v23  ;;  %1689 = vmatprep.subr.bf16.mxu0 %v1527_v43  ;;  %1768 = vmatpush1.bf16.msra.mxu1 %v1514_v16  ;;  %v1517_v14 = vld [vmem:[#allocation2 + $0x78] sm:$0xff]  ;;  %v1516_v38 = vld [vmem:[#allocation2 + $0x70] sm:$0xff]  ;;  %v1534_v45 = vld [vmem:[%s4150_s5] sm:$0xff]  ;;  %v1558_v12 = vsub.s32 5, %v3640_v19  ;;  %v1550_v49 = vsub.s32 3, %v3640_v19 }
 0x5c9   :  { %v1633_v7 = vsel %vm683_vm7, %v1632_v39, %v1628_v15  ;;  %v1662_v2 = vsel %vm669_vm5, %v1661_v25, %v1657_v53  ;;  %1769 = vmatprep.subr.bf16.mxu1 %v1523_v58  ;;  %v1525_v50 = vld [vmem:[#allocation2 + $0xb8] sm:$0xff]  ;;  %v1539_v35 = vrot.slane %v1534_v45, %v3751_v3  ;;  %v1555_v32 = vrot.slane %v1534_v45, %v1554_v0 }
 0x5ca   :  { %v1638_v37 = vsel %vm690_vm8, %v1637_v8, %v1633_v7  ;;  %v1667_v36 = vsel %vm676_vm6, %v1666_v26, %v1662_v2  ;;  %v1559_v54 = vrot.slane %v1534_v45, %v1558_v12  ;;  %v1551_v42 = vrot.slane %v1534_v45, %v1550_v49 }
 0x5cb   :  { %v1672_v1 = vsel %vm683_vm7, %v1671_v20, %v1667_v36  ;;  %1690 = vmatpush1.bf16.msra.mxu0 %v1526_v56 }
 0x5cc   :  { %v1677_v60 = vsel %vm690_vm8, %v1676_v27, %v1672_v1  ;;  %1724 = vmatprep.subr.bf16.mxu0 %v1505_v28  ;;  %1770 = vmatpush1.bf16.msra.mxu1 %v1522_v9  ;;  %v1546_v27 = vsub.s32 2, %v3640_v19  ;;  %v1562_v9 = vsub.s32 6, %v3640_v19 }
 0x5cd   :  { %v1678_v31 = vsel %vm731_vm9, %v1677_v60, %v1638_v37  ;;  %1771 = vmatprep.subr.bf16.mxu1 %v1531_v59 }
 0x5ce   :  { %v1679_v55 = vpack.c.b16 %v1678_v31, %v1678_v31  ;;  %v1547_v6 = vrot.slane %v1534_v45, %v1546_v27  ;;  %v1563_v59 = vrot.slane %v1534_v45, %v1562_v9 }
 0x5d0   :  { %2708 = vmatmul.mubr.msk.bf16.vlgmr.msra.gmra.mrb[4].mxu0 %vm507_vm0, %v1679_v55  ;;  %1772 = vmatpush1.bf16.msra.mxu1 %v1530_v18 }
 0x5d1   :  { %1725 = vmatpush1.bf16.msra.mxu0 %v1504_v21  ;;  %1756 = vmatprep.mubr.bf16.mxu0 %v3028_v33 }
 0x5d2   :  { %1726 = vmatprep.subr.bf16.mxu0 %v1513_v40 }
 0x5d3   :  { %2710 = vmatmul.mubr.msk.bf16.vlgmr.msra.gmra.mrb[4].mxu1 %vm507_vm0, %v1679_v55 }
 0x5d5   :  { %1727 = vmatpush1.bf16.msra.mxu0 %v1512_v22 }
 0x5d6   :  { %1728 = vmatprep.subr.bf16.mxu0 %v1521_v51 }
 0x5d9   :  { %1729 = vmatpush1.bf16.msra.mxu0 %v1520_v34 }
 0x5da   :  { %1730 = vmatprep.subr.bf16.mxu0 %v1529_v46 }
 0x5dd   :  { %1731 = vmatpush1.bf16.msra.mxu0 %v1528_v4 }
 0x5de   :  { %1806 = vmatprep.subr.bf16.mxu0 %v1509_v62 }
 0x5e0   :  { %2709 = vmatmul.mubr.msk.bf16.vlgmr.msra.gmra.mrb[8].mxu0 %vm507_vm0, %v1679_v55 }
 0x5e1   :  { %1807 = vmatpush1.bf16.msra.mxu0 %v1508_v61  ;;  %1838 = vmatprep.mubr.bf16.mxu0 %v3028_v33  ;;  %v1543_v33 = vrot.slane %v1534_v45, %v3755_v13 }
 0x5e2   :  { %1808 = vmatprep.subr.bf16.mxu0 %v1517_v14 }
 0x5e5   :  { %1809 = vmatpush1.bf16.msra.mxu0 %v1516_v38 }
 0x5e6   :  { %1810 = vmatprep.subr.bf16.mxu0 %v1525_v50 }
 0x5e9   :  { %1811 = vmatpush1.bf16.msra.mxu0 %v1524_v41 }
 0x5ea   :  { %1812 = vmatprep.subr.bf16.mxu0 %v1533_v29 }
 0x5ed   :  { %1813 = vmatpush1.bf16.msra.mxu0 %v1532_v57 }
 0x5f0   :  { %2711 = vmatmul.mubr.msk.bf16.vlgmr.msra.gmra.mrb[12].mxu0 %vm507_vm0, %v1679_v55  ;;  %v1566_v55 = vsub.s32 7, %v3640_v19 }
 0x5f2   :  { %v1567_v21 = vrot.slane %v1534_v45, %v1566_v55 }
 0x6a3   :  { %v1717_v17 = vpop.f32.mrb[4].mxu0 }
 0x6a4   :  { %v1718_v39 = vadd.f32 %v1717_v17, %v1539_v35  ;;  %v1719_v52 = vpop.f32.mrb[5].mxu0 }
 0x6a5   :  { %v1720_v30 = vadd.f32 %v1719_v52, %v1543_v33  ;;  %v1721_v47 = vpop.f32.mrb[6].mxu0 }
 0x6a6   :  { %vm1847_vm15 = vcmp.ge.f32.partialorder %v1718_v39, 0.0  ;;  %v1855_v24 = vmul.f32 0.2, %v1718_v39  ;;  %v1722_v25 = vpop.f32.mrb[7].mxu0  ;;  %v1799_v48 = vpop.f32.mrb[4].mxu1 }
 0x6a7   :  { %vm1848_vm0 = vcmp.ge.f32.partialorder %v1720_v30, 0.0  ;;  %v1856_v44 = vmul.f32 0.2, %v1720_v30  ;;  %v1800_v10 = vadd.f32 %v1799_v48, %v1555_v32  ;;  %v1801_v63 = vpop.f32.mrb[5].mxu1 }
 0x6a8   :  { %v4041_v8 = vsel %vm1847_vm15, %v1718_v39, %v1855_v24  ;;  %v1802_v23 = vadd.f32 %v1801_v63, %v1559_v54  ;;  %v1803_v20 = vpop.f32.mrb[6].mxu1 }
 0x6a9   :  { %v1864_v26 = vsel %vm1848_vm0, %v1720_v30, %v1856_v44  ;;  %vm1851_vm1 = vcmp.ge.f32.partialorder %v1800_v10, 0.0  ;;  %v1859_v15 = vmul.f32 0.2, %v1800_v10  ;;  %v1804_v53 = vpop.f32.mrb[7].mxu1 }
 0x6aa   :  { %vm1852_vm2 = vcmp.ge.f32.partialorder %v1802_v23, 0.0  ;;  %v1860_v11 = vmul.f32 0.2, %v1802_v23 }
 0x6ab   :  { %v4045_v7 = vsel %vm1851_vm1, %v1800_v10, %v1859_v15 }
 0x6ac   :  { %v4047_v2 = vsel %vm1852_vm2, %v1802_v23, %v1860_v11 }
 0x6b3   :  { %v1758_v37 = vpop.f32.mrb[8].mxu0 }
 0x6b4   :  { %v1759_v36 = vadd.f32 %v1758_v37, %v1547_v6  ;;  %v1760_v43 = vpop.f32.mrb[9].mxu0 }
 0x6b5   :  { %v1761_v1 = vadd.f32 %v1760_v43, %v1551_v42  ;;  %v1762_v16 = vpop.f32.mrb[10].mxu0 }
 0x6b6   :  { %vm1849_vm3 = vcmp.ge.f32.partialorder %v1759_v36, 0.0  ;;  %v1857_v60 = vmul.f32 0.2, %v1759_v36  ;;  %v1763_v58 = vpop.f32.mrb[11].mxu0 }
 0x6b7   :  { %vm1850_vm4 = vcmp.ge.f32.partialorder %v1761_v1, 0.0  ;;  %v1858_v31 = vmul.f32 0.2, %v1761_v1 }
 0x6b8   :  { %v4053_v56 = vsel %vm1849_vm3, %v1759_v36, %v1857_v60 }
 0x6b9   :  { %v4055_v28 = vsel %vm1850_vm4, %v1761_v1, %v1858_v31 }
 0x6c3   :  { %v1840_v40 = vpop.f32.mrb[12].mxu0 }
 0x6c4   :  { %v1841_v18 = vadd.f32 %v1840_v40, %v1563_v59  ;;  %v1842_v22 = vpop.f32.mrb[13].mxu0 }
 0x6c5   :  { %v1843_v51 = vadd.f32 %v1842_v22, %v1567_v21  ;;  %v1844_v34 = vpop.f32.mrb[14].mxu0 }
 0x6c6   :  { %vm1853_vm5 = vcmp.ge.f32.partialorder %v1841_v18, 0.0  ;;  %v1861_v46 = vmul.f32 0.2, %v1841_v18  ;;  %v1845_v4 = vpop.f32.mrb[15].mxu0 }
 0x6c7   :  { %vm1854_vm6 = vcmp.ge.f32.partialorder %v1843_v51, 0.0  ;;  %v1862_v62 = vmul.f32 0.2, %v1843_v51 }
 0x6c8   :  { %v4059_v61 = vsel %vm1853_vm5, %v1841_v18, %v1861_v46 }
 0x6c9   :  { %v4061_v14 = vsel %vm1854_vm6, %v1843_v51, %v1862_v62 }
 0x6ca   :  { %3006 = dma.done.wait [#allocation5 + $0x1], 32768 }
 0x6cb   :  { %3007 = vsyncadd [#allocation5 + $0x1], 4294934528  ;;  %v1876_v38 = vpack.c.bf16 %v1864_v26, %v1864_v26  ;;  %v1884_v50 = vld [vmem:[#allocation3 + $0x8] sm:$0xff]  ;;  %v1886_v41 = vld [vmem:[#allocation3 + $0x18] sm:$0xff] }
 0x6cc   :  { %v1883_v29 = vld [vmem:[#allocation3] sm:$0xff]  ;;  %2161 = vmatprep.subr.bf16.mxu1 %v1884_v50  ;;  %2325 = vmatprep.subr.bf16.mxu0 %v1886_v41  ;;  %v1885_v57 = vld [vmem:[#allocation3 + $0x10] sm:$0xff]  ;;  %v1888_v45 = vld [vmem:[#allocation3 + $0x28] sm:$0xff] }
 0x6cd   :  { %2193 = vmatprep.mubr.bf16.mxu1 %v1876_v38  ;;  %2357 = vmatprep.mubr.bf16.mxu0 %v1876_v38  ;;  %v1890_v35 = vld [vmem:[#allocation3 + $0x38] sm:$0xff]  ;;  %v1887_v33 = vld [vmem:[#allocation3 + $0x20] sm:$0xff]  ;;  %v1889_v0 = vld [vmem:[#allocation3 + $0x30] sm:$0xff] }
 0x6ce   :  { %2162 = vmatpush1.bf16.msra.mxu1 %v1883_v29  ;;  %2326 = vmatpush1.bf16.msra.mxu0 %v1885_v57  ;;  %v1892_v12 = vld [vmem:[#allocation3 + $0x48] sm:$0xff]  ;;  %v1894_v17 = vld [vmem:[#allocation3 + $0x58] sm:$0xff]  ;;  %v1891_v39 = vld [vmem:[#allocation3 + $0x40] sm:$0xff] }
 0x6cf   :  { %2163 = vmatprep.subr.bf16.mxu1 %v1888_v45  ;;  %2327 = vmatprep.subr.bf16.mxu0 %v1890_v35  ;;  %v1893_v52 = vld [vmem:[#allocation3 + $0x50] sm:$0xff]  ;;  %v1896_v30 = vld [vmem:[#allocation3 + $0x68] sm:$0xff]  ;;  %v1898_v47 = vld [vmem:[#allocation3 + $0x78] sm:$0xff] }
 0x6d0   :  { %v1895_v32 = vld [vmem:[#allocation3 + $0x60] sm:$0xff]  ;;  %v1897_v24 = vld [vmem:[#allocation3 + $0x70] sm:$0xff]  ;;  %v1900_v25 = vld [vmem:[#allocation3 + $0x88] sm:$0xff] }
 0x6d1   :  { %v1902_v54 = vld [vmem:[#allocation3 + $0x98] sm:$0xff]  ;;  %v1899_v44 = vld [vmem:[#allocation3 + $0x80] sm:$0xff]  ;;  %v1901_v48 = vld [vmem:[#allocation3 + $0x90] sm:$0xff] }
 0x6d2   :  { %2164 = vmatpush1.bf16.msra.mxu1 %v1887_v33  ;;  %2328 = vmatpush1.bf16.msra.mxu0 %v1889_v0  ;;  %v1904_v26 = vld [vmem:[#allocation3 + $0xa8] sm:$0xff]  ;;  %v1906_v10 = vld [vmem:[#allocation3 + $0xb8] sm:$0xff]  ;;  %v1903_v63 = vld [vmem:[#allocation3 + $0xa0] sm:$0xff] }
 0x6d3   :  { %2165 = vmatprep.subr.bf16.mxu1 %v1892_v12  ;;  %2329 = vmatprep.subr.bf16.mxu0 %v1894_v17  ;;  %v1905_v23 = vld [vmem:[#allocation3 + $0xb0] sm:$0xff]  ;;  %v1908_v20 = vld [vmem:[#allocation3 + $0xc8] sm:$0xff]  ;;  %v1910_v15 = vld [vmem:[#allocation3 + $0xd8] sm:$0xff] }
 0x6d4   :  { %v1907_v53 = vld [vmem:[#allocation3 + $0xc0] sm:$0xff]  ;;  %v1909_v11 = vld [vmem:[#allocation3 + $0xd0] sm:$0xff]  ;;  %v1912_v6 = vld [vmem:[#allocation3 + $0xe8] sm:$0xff] }
 0x6d5   :  { %v1914_v42 = vld [vmem:[#allocation3 + $0xf8] sm:$0xff]  ;;  %v1911_v37 = vld [vmem:[#allocation3 + $0xe0] sm:$0xff]  ;;  %v1913_v36 = vld [vmem:[#allocation3 + $0xf0] sm:$0xff] }
 0x6d6   :  { %2166 = vmatpush1.bf16.msra.mxu1 %v1891_v39  ;;  %2330 = vmatpush1.bf16.msra.mxu0 %v1893_v52  ;;  %v1916_v43 = vld [vmem:[#allocation3 + $0x108] sm:$0xff]  ;;  %v1918_v1 = vld [vmem:[#allocation3 + $0x118] sm:$0xff]  ;;  %v1915_v16 = vld [vmem:[#allocation3 + $0x100] sm:$0xff] }
 0x6d7   :  { %2167 = vmatprep.subr.bf16.mxu1 %v1896_v30  ;;  %2331 = vmatprep.subr.bf16.mxu0 %v1898_v47  ;;  %v1917_v60 = vld [vmem:[#allocation3 + $0x110] sm:$0xff]  ;;  %v1920_v58 = vld [vmem:[#allocation3 + $0x128] sm:$0xff]  ;;  %v1922_v31 = vld [vmem:[#allocation3 + $0x138] sm:$0xff] }
 0x6d8   :  { %v1919_v9 = vld [vmem:[#allocation3 + $0x120] sm:$0xff]  ;;  %v1921_v55 = vld [vmem:[#allocation3 + $0x130] sm:$0xff]  ;;  %v1924_v59 = vld [vmem:[#allocation3 + $0x148] sm:$0xff] }
 0x6d9   :  { %v1926_v21 = vld [vmem:[#allocation3 + $0x158] sm:$0xff]  ;;  %v1923_v40 = vld [vmem:[#allocation3 + $0x140] sm:$0xff]  ;;  %v1925_v18 = vld [vmem:[#allocation3 + $0x150] sm:$0xff] }
 0x6da   :  { %2168 = vmatpush1.bf16.msra.mxu1 %v1895_v32  ;;  %2332 = vmatpush1.bf16.msra.mxu0 %v1897_v24  ;;  %v1928_v22 = vld [vmem:[#allocation3 + $0x168] sm:$0xff]  ;;  %v1930_v51 = vld [vmem:[#allocation3 + $0x178] sm:$0xff]  ;;  %v1927_v34 = vld [vmem:[#allocation3 + $0x160] sm:$0xff]  ;;  %v1875_v24 = vpack.c.bf16 %v4041_v8, %v4041_v8 }
 0x6db   :  { %2169 = vmatprep.subr.bf16.mxu1 %v1900_v25  ;;  %2333 = vmatprep.subr.bf16.mxu0 %v1902_v54  ;;  %v1929_v46 = vld [vmem:[#allocation3 + $0x170] sm:$0xff]  ;;  %v1932_v4 = vld [vmem:[#allocation3 + $0x188] sm:$0xff]  ;;  %v1934_v62 = vld [vmem:[#allocation3 + $0x198] sm:$0xff] }
 0x6dc   :  { %v1931_v38 = vld [vmem:[#allocation3 + $0x180] sm:$0xff]  ;;  %v1933_v50 = vld [vmem:[#allocation3 + $0x190] sm:$0xff]  ;;  %v1936_v41 = vld [vmem:[#allocation3 + $0x1a8] sm:$0xff] }
 0x6dd   :  { %v1938_v29 = vld [vmem:[#allocation3 + $0x1b8] sm:$0xff]  ;;  %v1935_v57 = vld [vmem:[#allocation3 + $0x1a0] sm:$0xff]  ;;  %v1937_v45 = vld [vmem:[#allocation3 + $0x1b0] sm:$0xff] }
 0x6de   :  { %2170 = vmatpush1.bf16.msra.mxu1 %v1899_v44  ;;  %2334 = vmatpush1.bf16.msra.mxu0 %v1901_v48  ;;  %v1940_v35 = vld [vmem:[#allocation3 + $0x1c8] sm:$0xff]  ;;  %v1942_v33 = vld [vmem:[#allocation3 + $0x1d8] sm:$0xff]  ;;  %v1939_v0 = vld [vmem:[#allocation3 + $0x1c0] sm:$0xff] }
 0x6df   :  { %2171 = vmatprep.subr.bf16.mxu1 %v1904_v26  ;;  %2335 = vmatprep.subr.bf16.mxu0 %v1906_v10  ;;  %v1941_v12 = vld [vmem:[#allocation3 + $0x1d0] sm:$0xff]  ;;  %v1944_v17 = vld [vmem:[#allocation3 + $0x1e8] sm:$0xff]  ;;  %v1946_v39 = vld [vmem:[#allocation3 + $0x1f8] sm:$0xff]  ;;  %v1878_v26 = vpack.c.bf16 %v4055_v28, %v4055_v28 }
 0x6e0   :  { %v1943_v52 = vld [vmem:[#allocation3 + $0x1e0] sm:$0xff]  ;;  %v1945_v30 = vld [vmem:[#allocation3 + $0x1f0] sm:$0xff]  ;;  %v1948_v47 = vld [vmem:[#allocation3 + $0x208] sm:$0xff] }
 0x6e1   :  { %v1950_v32 = vld [vmem:[#allocation3 + $0x218] sm:$0xff]  ;;  %v1947_v25 = vld [vmem:[#allocation3 + $0x200] sm:$0xff]  ;;  %v1949_v54 = vld [vmem:[#allocation3 + $0x210] sm:$0xff] }
 0x6e2   :  { %2172 = vmatpush1.bf16.msra.mxu1 %v1903_v63  ;;  %2336 = vmatpush1.bf16.msra.mxu0 %v1905_v23  ;;  %v1952_v44 = vld [vmem:[#allocation3 + $0x228] sm:$0xff]  ;;  %v1954_v48 = vld [vmem:[#allocation3 + $0x238] sm:$0xff]  ;;  %v1951_v10 = vld [vmem:[#allocation3 + $0x220] sm:$0xff] }
 0x6e3   :  { %2173 = vmatprep.subr.bf16.mxu1 %v1908_v20  ;;  %2337 = vmatprep.subr.bf16.mxu0 %v1910_v15  ;;  %v1953_v63 = vld [vmem:[#allocation3 + $0x230] sm:$0xff]  ;;  %v1956_v8 = vld [vmem:[#allocation3 + $0x248] sm:$0xff]  ;;  %v1958_v23 = vld [vmem:[#allocation3 + $0x258] sm:$0xff] }
 0x6e4   :  { %v1955_v20 = vld [vmem:[#allocation3 + $0x240] sm:$0xff]  ;;  %v1957_v15 = vld [vmem:[#allocation3 + $0x250] sm:$0xff]  ;;  %v1962_v28 = vld [vmem:[#allocation3 + $0x278] sm:$0xff] }
 0x6e6   :  { %2174 = vmatpush1.bf16.msra.mxu1 %v1907_v53  ;;  %2338 = vmatpush1.bf16.msra.mxu0 %v1909_v11  ;;  %v1960_v53 = vld [vmem:[#allocation3 + $0x268] sm:$0xff]  ;;  %v1959_v11 = vld [vmem:[#allocation3 + $0x260] sm:$0xff] }
 0x6e7   :  { %2175 = vmatprep.subr.bf16.mxu1 %v1912_v6  ;;  %2339 = vmatprep.subr.bf16.mxu0 %v1914_v42  ;;  %v1961_v6 = vld [vmem:[#allocation3 + $0x270] sm:$0xff]  ;;  %v1964_v42 = vld [vmem:[#allocation3 + $0x288] sm:$0xff] }
 0x6ea   :  { %2176 = vmatpush1.bf16.msra.mxu1 %v1911_v37  ;;  %2340 = vmatpush1.bf16.msra.mxu0 %v1913_v36  ;;  %v1966_v37 = vld [vmem:[#allocation3 + $0x298] sm:$0xff]  ;;  %v1963_v36 = vld [vmem:[#allocation3 + $0x280] sm:$0xff] }
 0x6eb   :  { %2177 = vmatprep.subr.bf16.mxu1 %v1916_v43  ;;  %2341 = vmatprep.subr.bf16.mxu0 %v1918_v1  ;;  %v1965_v43 = vld [vmem:[#allocation3 + $0x290] sm:$0xff]  ;;  %v1968_v1 = vld [vmem:[#allocation3 + $0x2a8] sm:$0xff] }
 0x6ee   :  { %2178 = vmatpush1.bf16.msra.mxu1 %v1915_v16  ;;  %2342 = vmatpush1.bf16.msra.mxu0 %v1917_v60  ;;  %v1970_v16 = vld [vmem:[#allocation3 + $0x2b8] sm:$0xff]  ;;  %v1967_v60 = vld [vmem:[#allocation3 + $0x2a0] sm:$0xff] }
 0x6ef   :  { %2179 = vmatprep.subr.bf16.mxu1 %v1920_v58  ;;  %2343 = vmatprep.subr.bf16.mxu0 %v1922_v31  ;;  %v1969_v58 = vld [vmem:[#allocation3 + $0x2b0] sm:$0xff]  ;;  %v1972_v31 = vld [vmem:[#allocation3 + $0x2c8] sm:$0xff] }
 0x6f2   :  { %2180 = vmatpush1.bf16.msra.mxu1 %v1919_v9  ;;  %2344 = vmatpush1.bf16.msra.mxu0 %v1921_v55  ;;  %v1974_v9 = vld [vmem:[#allocation3 + $0x2d8] sm:$0xff]  ;;  %v1971_v55 = vld [vmem:[#allocation3 + $0x2c0] sm:$0xff] }
 0x6f3   :  { %2181 = vmatprep.subr.bf16.mxu1 %v1924_v59  ;;  %2345 = vmatprep.subr.bf16.mxu0 %v1926_v21  ;;  %v1973_v59 = vld [vmem:[#allocation3 + $0x2d0] sm:$0xff]  ;;  %v1976_v21 = vld [vmem:[#allocation3 + $0x2e8] sm:$0xff] }
 0x6f6   :  { %2182 = vmatpush1.bf16.msra.mxu1 %v1923_v40  ;;  %2346 = vmatpush1.bf16.msra.mxu0 %v1925_v18  ;;  %v1978_v40 = vld [vmem:[#allocation3 + $0x2f8] sm:$0xff]  ;;  %v1975_v18 = vld [vmem:[#allocation3 + $0x2e0] sm:$0xff] }
 0x6f7   :  { %2183 = vmatprep.subr.bf16.mxu1 %v1928_v22  ;;  %2347 = vmatprep.subr.bf16.mxu0 %v1930_v51  ;;  %v1977_v22 = vld [vmem:[#allocation3 + $0x2f0] sm:$0xff]  ;;  %v1980_v51 = vld [vmem:[#allocation3 + $0x308] sm:$0xff] }
 0x6fa   :  { %2184 = vmatpush1.bf16.msra.mxu1 %v1927_v34  ;;  %2348 = vmatpush1.bf16.msra.mxu0 %v1929_v46  ;;  %v1982_v34 = vld [vmem:[#allocation3 + $0x318] sm:$0xff]  ;;  %v1979_v46 = vld [vmem:[#allocation3 + $0x300] sm:$0xff] }
 0x6fb   :  { %2185 = vmatprep.subr.bf16.mxu1 %v1932_v4  ;;  %2349 = vmatprep.subr.bf16.mxu0 %v1934_v62  ;;  %v1981_v4 = vld [vmem:[#allocation3 + $0x310] sm:$0xff]  ;;  %v1984_v62 = vld [vmem:[#allocation3 + $0x328] sm:$0xff] }
 0x6fe   :  { %2186 = vmatpush1.bf16.msra.mxu1 %v1931_v38  ;;  %2350 = vmatpush1.bf16.msra.mxu0 %v1933_v50  ;;  %v1986_v38 = vld [vmem:[#allocation3 + $0x338] sm:$0xff]  ;;  %v1983_v50 = vld [vmem:[#allocation3 + $0x320] sm:$0xff] }
 0x6ff   :  { %2187 = vmatprep.subr.bf16.mxu1 %v1936_v41  ;;  %2351 = vmatprep.subr.bf16.mxu0 %v1938_v29  ;;  %v1985_v41 = vld [vmem:[#allocation3 + $0x330] sm:$0xff]  ;;  %v1988_v29 = vld [vmem:[#allocation3 + $0x348] sm:$0xff] }
 0x702   :  { %2188 = vmatpush1.bf16.msra.mxu1 %v1935_v57  ;;  %2352 = vmatpush1.bf16.msra.mxu0 %v1937_v45  ;;  %v1990_v57 = vld [vmem:[#allocation3 + $0x358] sm:$0xff]  ;;  %v1987_v45 = vld [vmem:[#allocation3 + $0x340] sm:$0xff] }
 0x703   :  { %2189 = vmatprep.subr.bf16.mxu1 %v1940_v35  ;;  %2353 = vmatprep.subr.bf16.mxu0 %v1942_v33  ;;  %v1989_v35 = vld [vmem:[#allocation3 + $0x350] sm:$0xff]  ;;  %v1992_v33 = vld [vmem:[#allocation3 + $0x368] sm:$0xff] }
 0x706   :  { %2190 = vmatpush1.bf16.msra.mxu1 %v1939_v0  ;;  %2354 = vmatpush1.bf16.msra.mxu0 %v1941_v12  ;;  %v1994_v0 = vld [vmem:[#allocation3 + $0x378] sm:$0xff]  ;;  %v1991_v12 = vld [vmem:[#allocation3 + $0x360] sm:$0xff] }
 0x707   :  { %2191 = vmatprep.subr.bf16.mxu1 %v1944_v17  ;;  %2355 = vmatprep.subr.bf16.mxu0 %v1946_v39  ;;  %v1993_v17 = vld [vmem:[#allocation3 + $0x370] sm:$0xff]  ;;  %v1996_v39 = vld [vmem:[#allocation3 + $0x388] sm:$0xff] }
 0x70a   :  { %2192 = vmatpush1.bf16.msra.mxu1 %v1943_v52  ;;  %2356 = vmatpush1.bf16.msra.mxu0 %v1945_v30  ;;  %v1998_v52 = vld [vmem:[#allocation3 + $0x398] sm:$0xff]  ;;  %v1995_v30 = vld [vmem:[#allocation3 + $0x380] sm:$0xff] }
 0x70b   :  { %2202 = vmatprep.subr.bf16.mxu1 %v1948_v47  ;;  %2366 = vmatprep.subr.bf16.mxu0 %v1950_v32  ;;  %v1997_v47 = vld [vmem:[#allocation3 + $0x390] sm:$0xff]  ;;  %v2000_v32 = vld [vmem:[#allocation3 + $0x3a8] sm:$0xff] }
 0x70d   :  { %2194 = vmatmul.mubr.bf16.vlgmr.msra.gmra.mrb[8].mxu1 %v1875_v24  ;;  %2358 = vmatmul.mubr.bf16.vlgmr.msra.gmra.mrb[16].mxu0 %v1875_v24  ;;  %v2002_v24 = vld [vmem:[#allocation3 + $0x3b8] sm:$0xff] }
 0x70e   :  { %2203 = vmatpush1.bf16.msra.mxu1 %v1947_v25  ;;  %2367 = vmatpush1.bf16.msra.mxu0 %v1949_v54  ;;  %v1999_v25 = vld [vmem:[#allocation3 + $0x3a0] sm:$0xff]  ;;  %v2001_v54 = vld [vmem:[#allocation3 + $0x3b0] sm:$0xff] }
 0x70f   :  { %2204 = vmatprep.subr.bf16.mxu1 %v1952_v44  ;;  %2368 = vmatprep.subr.bf16.mxu0 %v1954_v48  ;;  %v2004_v44 = vld [vmem:[#allocation3 + $0x3c8] sm:$0xff]  ;;  %v2006_v48 = vld [vmem:[#allocation3 + $0x3d8] sm:$0xff] }
 0x710   :  { %2234 = vmatprep.mubr.bf16.mxu1 %v1878_v26  ;;  %2398 = vmatprep.mubr.bf16.mxu0 %v1878_v26  ;;  %v2003_v26 = vld [vmem:[#allocation3 + $0x3c0] sm:$0xff] }
 0x712   :  { %2205 = vmatpush1.bf16.msra.mxu1 %v1951_v10  ;;  %2369 = vmatpush1.bf16.msra.mxu0 %v1953_v63  ;;  %v2005_v10 = vld [vmem:[#allocation3 + $0x3d0] sm:$0xff]  ;;  %v2008_v63 = vld [vmem:[#allocation3 + $0x3e8] sm:$0xff] }
 0x713   :  { %2206 = vmatprep.subr.bf16.mxu1 %v1956_v8  ;;  %2370 = vmatprep.subr.bf16.mxu0 %v1958_v23  ;;  %v2010_v8 = vld [vmem:[#allocation3 + $0x3f8] sm:$0xff]  ;;  %v2007_v23 = vld [vmem:[#allocation3 + $0x3e0] sm:$0xff] }
 0x716   :  { %2207 = vmatpush1.bf16.msra.mxu1 %v1955_v20  ;;  %2371 = vmatpush1.bf16.msra.mxu0 %v1957_v15  ;;  %v2009_v20 = vld [vmem:[#allocation3 + $0x3f0] sm:$0xff]  ;;  %v2012_v15 = vld [vmem:[#allocation3 + $0x408] sm:$0xff] }
 0x717   :  { %2208 = vmatprep.subr.bf16.mxu1 %v1960_v53  ;;  %2372 = vmatprep.subr.bf16.mxu0 %v1962_v28  ;;  %v2014_v53 = vld [vmem:[#allocation3 + $0x418] sm:$0xff]  ;;  %v1877_v28 = vpack.c.bf16 %v4053_v56, %v4053_v56  ;;  %v2020_v56 = vld [vmem:[#allocation3 + $0x448] sm:$0xff] }
 0x71a   :  { %2209 = vmatpush1.bf16.msra.mxu1 %v1959_v11  ;;  %2373 = vmatpush1.bf16.msra.mxu0 %v1961_v6  ;;  %v2011_v11 = vld [vmem:[#allocation3 + $0x400] sm:$0xff]  ;;  %v2013_v6 = vld [vmem:[#allocation3 + $0x410] sm:$0xff] }
 0x71b   :  { %2210 = vmatprep.subr.bf16.mxu1 %v1964_v42  ;;  %2374 = vmatprep.subr.bf16.mxu0 %v1966_v37  ;;  %v2016_v42 = vld [vmem:[#allocation3 + $0x428] sm:$0xff]  ;;  %v2018_v37 = vld [vmem:[#allocation3 + $0x438] sm:$0xff] }
 0x71e   :  { %2211 = vmatpush1.bf16.msra.mxu1 %v1963_v36  ;;  %2375 = vmatpush1.bf16.msra.mxu0 %v1965_v43  ;;  %v1880_v36 = vpack.c.bf16 %v4047_v2, %v4047_v2  ;;  %v2015_v43 = vld [vmem:[#allocation3 + $0x420] sm:$0xff]  ;;  %v2026_v2 = vld [vmem:[#allocation3 + $0x478] sm:$0xff] }
 0x71f   :  { %2212 = vmatprep.subr.bf16.mxu1 %v1968_v1  ;;  %2376 = vmatprep.subr.bf16.mxu0 %v1970_v16  ;;  %v2017_v1 = vld [vmem:[#allocation3 + $0x430] sm:$0xff]  ;;  %v2022_v16 = vld [vmem:[#allocation3 + $0x458] sm:$0xff] }
 0x722   :  { %2213 = vmatpush1.bf16.msra.mxu1 %v1967_v60  ;;  %2377 = vmatpush1.bf16.msra.mxu0 %v1969_v58  ;;  %v2019_v60 = vld [vmem:[#allocation3 + $0x440] sm:$0xff]  ;;  %v2021_v58 = vld [vmem:[#allocation3 + $0x450] sm:$0xff] }
 0x723   :  { %2214 = vmatprep.subr.bf16.mxu1 %v1972_v31  ;;  %2378 = vmatprep.subr.bf16.mxu0 %v1974_v9  ;;  %v2024_v31 = vld [vmem:[#allocation3 + $0x468] sm:$0xff]  ;;  %v2023_v9 = vld [vmem:[#allocation3 + $0x460] sm:$0xff] }
 0x726   :  { %2215 = vmatpush1.bf16.msra.mxu1 %v1971_v55  ;;  %2379 = vmatpush1.bf16.msra.mxu0 %v1973_v59  ;;  %v2025_v55 = vld [vmem:[#allocation3 + $0x470] sm:$0xff]  ;;  %v2028_v59 = vld [vmem:[#allocation3 + $0x488] sm:$0xff] }
 0x727   :  { %2216 = vmatprep.subr.bf16.mxu1 %v1976_v21  ;;  %2380 = vmatprep.subr.bf16.mxu0 %v1978_v40  ;;  %v2030_v21 = vld [vmem:[#allocation3 + $0x498] sm:$0xff]  ;;  %v2027_v40 = vld [vmem:[#allocation3 + $0x480] sm:$0xff] }
 0x72a   :  { %2217 = vmatpush1.bf16.msra.mxu1 %v1975_v18  ;;  %2381 = vmatpush1.bf16.msra.mxu0 %v1977_v22  ;;  %v2029_v18 = vld [vmem:[#allocation3 + $0x490] sm:$0xff]  ;;  %v2032_v22 = vld [vmem:[#allocation3 + $0x4a8] sm:$0xff] }
 0x72b   :  { %2218 = vmatprep.subr.bf16.mxu1 %v1980_v51  ;;  %2382 = vmatprep.subr.bf16.mxu0 %v1982_v34  ;;  %v2034_v51 = vld [vmem:[#allocation3 + $0x4b8] sm:$0xff]  ;;  %v2031_v34 = vld [vmem:[#allocation3 + $0x4a0] sm:$0xff] }
 0x72e   :  { %2219 = vmatpush1.bf16.msra.mxu1 %v1979_v46  ;;  %2383 = vmatpush1.bf16.msra.mxu0 %v1981_v4  ;;  %v2033_v46 = vld [vmem:[#allocation3 + $0x4b0] sm:$0xff]  ;;  %v2036_v4 = vld [vmem:[#allocation3 + $0x4c8] sm:$0xff] }
 0x72f   :  { %2220 = vmatprep.subr.bf16.mxu1 %v1984_v62  ;;  %2384 = vmatprep.subr.bf16.mxu0 %v1986_v38  ;;  %v2038_v62 = vld [vmem:[#allocation3 + $0x4d8] sm:$0xff]  ;;  %v2035_v38 = vld [vmem:[#allocation3 + $0x4c0] sm:$0xff] }
 0x732   :  { %2221 = vmatpush1.bf16.msra.mxu1 %v1983_v50  ;;  %2385 = vmatpush1.bf16.msra.mxu0 %v1985_v41  ;;  %v2037_v50 = vld [vmem:[#allocation3 + $0x4d0] sm:$0xff]  ;;  %v2040_v41 = vld [vmem:[#allocation3 + $0x4e8] sm:$0xff] }
 0x733   :  { %2222 = vmatprep.subr.bf16.mxu1 %v1988_v29  ;;  %2386 = vmatprep.subr.bf16.mxu0 %v1990_v57  ;;  %v2042_v29 = vld [vmem:[#allocation3 + $0x4f8] sm:$0xff]  ;;  %v2039_v57 = vld [vmem:[#allocation3 + $0x4e0] sm:$0xff] }
 0x736   :  { %2223 = vmatpush1.bf16.msra.mxu1 %v1987_v45  ;;  %2387 = vmatpush1.bf16.msra.mxu0 %v1989_v35  ;;  %v2041_v45 = vld [vmem:[#allocation3 + $0x4f0] sm:$0xff]  ;;  %v2044_v35 = vld [vmem:[#allocation3 + $0x508] sm:$0xff] }
 0x737   :  { %2224 = vmatprep.subr.bf16.mxu1 %v1992_v33  ;;  %2388 = vmatprep.subr.bf16.mxu0 %v1994_v0  ;;  %v2046_v33 = vld [vmem:[#allocation3 + $0x518] sm:$0xff]  ;;  %v2043_v0 = vld [vmem:[#allocation3 + $0x500] sm:$0xff] }
 0x73a   :  { %2225 = vmatpush1.bf16.msra.mxu1 %v1991_v12  ;;  %2389 = vmatpush1.bf16.msra.mxu0 %v1993_v17  ;;  %v2045_v12 = vld [vmem:[#allocation3 + $0x510] sm:$0xff]  ;;  %v2048_v17 = vld [vmem:[#allocation3 + $0x528] sm:$0xff] }
 0x73b   :  { %2226 = vmatprep.subr.bf16.mxu1 %v1996_v39  ;;  %2390 = vmatprep.subr.bf16.mxu0 %v1998_v52  ;;  %v2050_v39 = vld [vmem:[#allocation3 + $0x538] sm:$0xff]  ;;  %v2047_v52 = vld [vmem:[#allocation3 + $0x520] sm:$0xff] }
 0x73e   :  { %2227 = vmatpush1.bf16.msra.mxu1 %v1995_v30  ;;  %2391 = vmatpush1.bf16.msra.mxu0 %v1997_v47  ;;  %v2049_v30 = vld [vmem:[#allocation3 + $0x530] sm:$0xff]  ;;  %v2052_v47 = vld [vmem:[#allocation3 + $0x548] sm:$0xff] }
 0x73f   :  { %2228 = vmatprep.subr.bf16.mxu1 %v2000_v32  ;;  %2392 = vmatprep.subr.bf16.mxu0 %v2002_v24  ;;  %v2054_v32 = vld [vmem:[#allocation3 + $0x558] sm:$0xff]  ;;  %v2051_v24 = vld [vmem:[#allocation3 + $0x540] sm:$0xff] }
 0x742   :  { %2229 = vmatpush1.bf16.msra.mxu1 %v1999_v25  ;;  %2393 = vmatpush1.bf16.msra.mxu0 %v2001_v54  ;;  %v2053_v25 = vld [vmem:[#allocation3 + $0x550] sm:$0xff]  ;;  %v2056_v54 = vld [vmem:[#allocation3 + $0x568] sm:$0xff] }
 0x743   :  { %2230 = vmatprep.subr.bf16.mxu1 %v2004_v44  ;;  %2394 = vmatprep.subr.bf16.mxu0 %v2006_v48  ;;  %v2058_v44 = vld [vmem:[#allocation3 + $0x578] sm:$0xff]  ;;  %v2055_v48 = vld [vmem:[#allocation3 + $0x560] sm:$0xff] }
 0x746   :  { %2231 = vmatpush1.bf16.msra.mxu1 %v2003_v26  ;;  %2395 = vmatpush1.bf16.msra.mxu0 %v2005_v10  ;;  %v2057_v26 = vld [vmem:[#allocation3 + $0x570] sm:$0xff]  ;;  %v2060_v10 = vld [vmem:[#allocation3 + $0x588] sm:$0xff] }
 0x747   :  { %2232 = vmatprep.subr.bf16.mxu1 %v2008_v63  ;;  %2396 = vmatprep.subr.bf16.mxu0 %v2010_v8  ;;  %v2062_v63 = vld [vmem:[#allocation3 + $0x598] sm:$0xff]  ;;  %v2059_v8 = vld [vmem:[#allocation3 + $0x580] sm:$0xff] }
 0x74a   :  { %2233 = vmatpush1.bf16.msra.mxu1 %v2007_v23  ;;  %2397 = vmatpush1.bf16.msra.mxu0 %v2009_v20  ;;  %v2061_v23 = vld [vmem:[#allocation3 + $0x590] sm:$0xff]  ;;  %v2064_v20 = vld [vmem:[#allocation3 + $0x5a8] sm:$0xff] }
 0x74b   :  { %2243 = vmatprep.subr.bf16.mxu1 %v2012_v15  ;;  %2407 = vmatprep.subr.bf16.mxu0 %v2014_v53  ;;  %v2066_v15 = vld [vmem:[#allocation3 + $0x5b8] sm:$0xff]  ;;  %v2063_v53 = vld [vmem:[#allocation3 + $0x5a0] sm:$0xff] }
 0x74d   :  { %2235 = vmatmul.mubr.bf16.vlgmr.msra.gmra.mrb[8].mxu1 %v1877_v28  ;;  %2399 = vmatmul.mubr.bf16.vlgmr.msra.gmra.mrb[16].mxu0 %v1877_v28  ;;  %v2065_v28 = vld [vmem:[#allocation3 + $0x5b0] sm:$0xff] }
 0x74e   :  { %2244 = vmatpush1.bf16.msra.mxu1 %v2011_v11  ;;  %2408 = vmatpush1.bf16.msra.mxu0 %v2013_v6  ;;  %v2068_v11 = vld [vmem:[#allocation3 + $0x5c8] sm:$0xff]  ;;  %v2070_v6 = vld [vmem:[#allocation3 + $0x5d8] sm:$0xff] }
 0x74f   :  { %2245 = vmatprep.subr.bf16.mxu1 %v2016_v42  ;;  %2409 = vmatprep.subr.bf16.mxu0 %v2018_v37  ;;  %v2067_v42 = vld [vmem:[#allocation3 + $0x5c0] sm:$0xff]  ;;  %v2069_v37 = vld [vmem:[#allocation3 + $0x5d0] sm:$0xff] }
 0x750   :  { %2275 = vmatprep.mubr.bf16.mxu1 %v1880_v36  ;;  %2439 = vmatprep.mubr.bf16.mxu0 %v1880_v36  ;;  %v2072_v36 = vld [vmem:[#allocation3 + $0x5e8] sm:$0xff] }
 0x752   :  { %2246 = vmatpush1.bf16.msra.mxu1 %v2015_v43  ;;  %2410 = vmatpush1.bf16.msra.mxu0 %v2017_v1  ;;  %v2074_v43 = vld [vmem:[#allocation3 + $0x5f8] sm:$0xff]  ;;  %v2071_v1 = vld [vmem:[#allocation3 + $0x5e0] sm:$0xff] }
 0x753   :  { %2247 = vmatprep.subr.bf16.mxu1 %v2020_v56  ;;  %2411 = vmatprep.subr.bf16.mxu0 %v2022_v16  ;;  %v2073_v56 = vld [vmem:[#allocation3 + $0x5f0] sm:$0xff]  ;;  %v2076_v16 = vld [vmem:[#allocation3 + $0x608] sm:$0xff] }
 0x756   :  { %2248 = vmatpush1.bf16.msra.mxu1 %v2019_v60  ;;  %2412 = vmatpush1.bf16.msra.mxu0 %v2021_v58  ;;  %v2078_v60 = vld [vmem:[#allocation3 + $0x618] sm:$0xff]  ;;  %v1879_v58 = vpack.c.bf16 %v4045_v7, %v4045_v7  ;;  %v2084_v7 = vld [vmem:[#allocation3 + $0x648] sm:$0xff] }
 0x757   :  { %2249 = vmatprep.subr.bf16.mxu1 %v2024_v31  ;;  %2413 = vmatprep.subr.bf16.mxu0 %v2026_v2  ;;  %v2075_v31 = vld [vmem:[#allocation3 + $0x600] sm:$0xff]  ;;  %v2077_v2 = vld [vmem:[#allocation3 + $0x610] sm:$0xff] }
 0x75a   :  { %2250 = vmatpush1.bf16.msra.mxu1 %v2023_v9  ;;  %2414 = vmatpush1.bf16.msra.mxu0 %v2025_v55  ;;  %v2080_v9 = vld [vmem:[#allocation3 + $0x628] sm:$0xff]  ;;  %v2082_v55 = vld [vmem:[#allocation3 + $0x638] sm:$0xff] }
 0x75b   :  { %2251 = vmatprep.subr.bf16.mxu1 %v2028_v59  ;;  %2415 = vmatprep.subr.bf16.mxu0 %v2030_v21  ;;  %v1882_v59 = vpack.c.bf16 %v4061_v14, %v4061_v14  ;;  %v2079_v21 = vld [vmem:[#allocation3 + $0x620] sm:$0xff]  ;;  %v2090_v14 = vld [vmem:[#allocation3 + $0x678] sm:$0xff] }
 0x75e   :  { %2252 = vmatpush1.bf16.msra.mxu1 %v2027_v40  ;;  %2416 = vmatpush1.bf16.msra.mxu0 %v2029_v18  ;;  %v2081_v40 = vld [vmem:[#allocation3 + $0x630] sm:$0xff]  ;;  %v2086_v18 = vld [vmem:[#allocation3 + $0x658] sm:$0xff] }
 0x75f   :  { %2253 = vmatprep.subr.bf16.mxu1 %v2032_v22  ;;  %2417 = vmatprep.subr.bf16.mxu0 %v2034_v51  ;;  %v2083_v22 = vld [vmem:[#allocation3 + $0x640] sm:$0xff]  ;;  %v2085_v51 = vld [vmem:[#allocation3 + $0x650] sm:$0xff] }
 0x762   :  { %2254 = vmatpush1.bf16.msra.mxu1 %v2031_v34  ;;  %2418 = vmatpush1.bf16.msra.mxu0 %v2033_v46  ;;  %v2088_v34 = vld [vmem:[#allocation3 + $0x668] sm:$0xff]  ;;  %v2087_v46 = vld [vmem:[#allocation3 + $0x660] sm:$0xff] }
 0x763   :  { %2255 = vmatprep.subr.bf16.mxu1 %v2036_v4  ;;  %2419 = vmatprep.subr.bf16.mxu0 %v2038_v62  ;;  %v2089_v4 = vld [vmem:[#allocation3 + $0x670] sm:$0xff]  ;;  %v2092_v62 = vld [vmem:[#allocation3 + $0x688] sm:$0xff] }
 0x766   :  { %2256 = vmatpush1.bf16.msra.mxu1 %v2035_v38  ;;  %2420 = vmatpush1.bf16.msra.mxu0 %v2037_v50  ;;  %v2094_v38 = vld [vmem:[#allocation3 + $0x698] sm:$0xff]  ;;  %v2091_v50 = vld [vmem:[#allocation3 + $0x680] sm:$0xff] }
 0x767   :  { %2257 = vmatprep.subr.bf16.mxu1 %v2040_v41  ;;  %2421 = vmatprep.subr.bf16.mxu0 %v2042_v29  ;;  %v2093_v41 = vld [vmem:[#allocation3 + $0x690] sm:$0xff]  ;;  %v2096_v29 = vld [vmem:[#allocation3 + $0x6a8] sm:$0xff] }
 0x76a   :  { %2258 = vmatpush1.bf16.msra.mxu1 %v2039_v57  ;;  %2422 = vmatpush1.bf16.msra.mxu0 %v2041_v45  ;;  %v2098_v57 = vld [vmem:[#allocation3 + $0x6b8] sm:$0xff]  ;;  %v2095_v45 = vld [vmem:[#allocation3 + $0x6a0] sm:$0xff] }
 0x76b   :  { %2259 = vmatprep.subr.bf16.mxu1 %v2044_v35  ;;  %2423 = vmatprep.subr.bf16.mxu0 %v2046_v33  ;;  %v2097_v35 = vld [vmem:[#allocation3 + $0x6b0] sm:$0xff]  ;;  %v2100_v33 = vld [vmem:[#allocation3 + $0x6c8] sm:$0xff] }
 0x76e   :  { %2260 = vmatpush1.bf16.msra.mxu1 %v2043_v0  ;;  %2424 = vmatpush1.bf16.msra.mxu0 %v2045_v12  ;;  %v2102_v0 = vld [vmem:[#allocation3 + $0x6d8] sm:$0xff]  ;;  %v2099_v12 = vld [vmem:[#allocation3 + $0x6c0] sm:$0xff] }
 0x76f   :  { %2261 = vmatprep.subr.bf16.mxu1 %v2048_v17  ;;  %2425 = vmatprep.subr.bf16.mxu0 %v2050_v39  ;;  %v2101_v17 = vld [vmem:[#allocation3 + $0x6d0] sm:$0xff]  ;;  %v2104_v39 = vld [vmem:[#allocation3 + $0x6e8] sm:$0xff] }
 0x772   :  { %2262 = vmatpush1.bf16.msra.mxu1 %v2047_v52  ;;  %2426 = vmatpush1.bf16.msra.mxu0 %v2049_v30  ;;  %v2106_v52 = vld [vmem:[#allocation3 + $0x6f8] sm:$0xff]  ;;  %v2103_v30 = vld [vmem:[#allocation3 + $0x6e0] sm:$0xff] }
 0x773   :  { %2263 = vmatprep.subr.bf16.mxu1 %v2052_v47  ;;  %2427 = vmatprep.subr.bf16.mxu0 %v2054_v32  ;;  %v2105_v47 = vld [vmem:[#allocation3 + $0x6f0] sm:$0xff]  ;;  %v2108_v32 = vld [vmem:[#allocation3 + $0x708] sm:$0xff] }
 0x776   :  { %2264 = vmatpush1.bf16.msra.mxu1 %v2051_v24  ;;  %2428 = vmatpush1.bf16.msra.mxu0 %v2053_v25  ;;  %v2110_v24 = vld [vmem:[#allocation3 + $0x718] sm:$0xff]  ;;  %v2107_v25 = vld [vmem:[#allocation3 + $0x700] sm:$0xff] }
 0x777   :  { %2265 = vmatprep.subr.bf16.mxu1 %v2056_v54  ;;  %2429 = vmatprep.subr.bf16.mxu0 %v2058_v44  ;;  %v2109_v54 = vld [vmem:[#allocation3 + $0x710] sm:$0xff]  ;;  %v2112_v44 = vld [vmem:[#allocation3 + $0x728] sm:$0xff] }
 0x77a   :  { %2266 = vmatpush1.bf16.msra.mxu1 %v2055_v48  ;;  %2430 = vmatpush1.bf16.msra.mxu0 %v2057_v26  ;;  %v2114_v48 = vld [vmem:[#allocation3 + $0x738] sm:$0xff]  ;;  %v2111_v26 = vld [vmem:[#allocation3 + $0x720] sm:$0xff] }
 0x77b   :  { %2267 = vmatprep.subr.bf16.mxu1 %v2060_v10  ;;  %2431 = vmatprep.subr.bf16.mxu0 %v2062_v63  ;;  %v2113_v10 = vld [vmem:[#allocation3 + $0x730] sm:$0xff]  ;;  %v2116_v63 = vld [vmem:[#allocation3 + $0x748] sm:$0xff] }
 0x77e   :  { %2268 = vmatpush1.bf16.msra.mxu1 %v2059_v8  ;;  %2432 = vmatpush1.bf16.msra.mxu0 %v2061_v23  ;;  %v2118_v8 = vld [vmem:[#allocation3 + $0x758] sm:$0xff]  ;;  %v2115_v23 = vld [vmem:[#allocation3 + $0x740] sm:$0xff] }
 0x77f   :  { %2269 = vmatprep.subr.bf16.mxu1 %v2064_v20  ;;  %2433 = vmatprep.subr.bf16.mxu0 %v2066_v15  ;;  %v2117_v20 = vld [vmem:[#allocation3 + $0x750] sm:$0xff]  ;;  %v2120_v15 = vld [vmem:[#allocation3 + $0x768] sm:$0xff] }
 0x782   :  { %2270 = vmatpush1.bf16.msra.mxu1 %v2063_v53  ;;  %2434 = vmatpush1.bf16.msra.mxu0 %v2065_v28  ;;  %v2122_v53 = vld [vmem:[#allocation3 + $0x778] sm:$0xff]  ;;  %v2119_v28 = vld [vmem:[#allocation3 + $0x760] sm:$0xff] }
 0x783   :  { %2271 = vmatprep.subr.bf16.mxu1 %v2068_v11  ;;  %2435 = vmatprep.subr.bf16.mxu0 %v2070_v6  ;;  %v2121_v11 = vld [vmem:[#allocation3 + $0x770] sm:$0xff]  ;;  %v2124_v6 = vld [vmem:[#allocation3 + $0x788] sm:$0xff] }
 0x786   :  { %2272 = vmatpush1.bf16.msra.mxu1 %v2067_v42  ;;  %2436 = vmatpush1.bf16.msra.mxu0 %v2069_v37  ;;  %v2126_v42 = vld [vmem:[#allocation3 + $0x798] sm:$0xff]  ;;  %v2123_v37 = vld [vmem:[#allocation3 + $0x780] sm:$0xff] }
 0x787   :  { %2273 = vmatprep.subr.bf16.mxu1 %v2072_v36  ;;  %2437 = vmatprep.subr.bf16.mxu0 %v2074_v43  ;;  %v2125_v36 = vld [vmem:[#allocation3 + $0x790] sm:$0xff]  ;;  %v2128_v43 = vld [vmem:[#allocation3 + $0x7a8] sm:$0xff] }
 0x78a   :  { %2274 = vmatpush1.bf16.msra.mxu1 %v2071_v1  ;;  %2438 = vmatpush1.bf16.msra.mxu0 %v2073_v56  ;;  %v2130_v1 = vld [vmem:[#allocation3 + $0x7b8] sm:$0xff]  ;;  %v2127_v56 = vld [vmem:[#allocation3 + $0x7a0] sm:$0xff] }
 0x78b   :  { %2284 = vmatprep.subr.bf16.mxu1 %v2076_v16  ;;  %2448 = vmatprep.subr.bf16.mxu0 %v2078_v60  ;;  %v2129_v16 = vld [vmem:[#allocation3 + $0x7b0] sm:$0xff]  ;;  %v2132_v60 = vld [vmem:[#allocation3 + $0x7c8] sm:$0xff] }
 0x78d   :  { %2276 = vmatmul.mubr.bf16.vlgmr.msra.gmra.mrb[8].mxu1 %v1879_v58  ;;  %2440 = vmatmul.mubr.bf16.vlgmr.msra.gmra.mrb[16].mxu0 %v1879_v58  ;;  %v2134_v58 = vld [vmem:[#allocation3 + $0x7d8] sm:$0xff] }
 0x78e   :  { %2285 = vmatpush1.bf16.msra.mxu1 %v2075_v31  ;;  %2449 = vmatpush1.bf16.msra.mxu0 %v2077_v2  ;;  %v2131_v31 = vld [vmem:[#allocation3 + $0x7c0] sm:$0xff]  ;;  %v2133_v2 = vld [vmem:[#allocation3 + $0x7d0] sm:$0xff] }
 0x78f   :  { %2286 = vmatprep.subr.bf16.mxu1 %v2080_v9  ;;  %2450 = vmatprep.subr.bf16.mxu0 %v2082_v55  ;;  %v2136_v9 = vld [vmem:[#allocation3 + $0x7e8] sm:$0xff]  ;;  %v2138_v55 = vld [vmem:[#allocation3 + $0x7f8] sm:$0xff] }
 0x790   :  { %2316 = vmatprep.mubr.bf16.mxu1 %v1882_v59  ;;  %2480 = vmatprep.mubr.bf16.mxu0 %v1882_v59  ;;  %v2135_v59 = vld [vmem:[#allocation3 + $0x7e0] sm:$0xff] }
 0x792   :  { %2287 = vmatpush1.bf16.msra.mxu1 %v2079_v21  ;;  %2451 = vmatpush1.bf16.msra.mxu0 %v2081_v40  ;;  %v2137_v21 = vld [vmem:[#allocation3 + $0x7f0] sm:$0xff]  ;;  %v1881_v40 = vpack.c.bf16 %v4059_v61, %v4059_v61 }
 0x793   :  { %2288 = vmatprep.subr.bf16.mxu1 %v2084_v7  ;;  %2452 = vmatprep.subr.bf16.mxu0 %v2086_v18  ;;  %v2139_v7 = vld [vmem:[%s4152_s7] sm:$0xf] }
 0x794   :  { %v2144_v18 = vrot.slane %v2139_v7, %v3751_v3 }
 0x796   :  { %2289 = vmatpush1.bf16.msra.mxu1 %v2083_v22  ;;  %2453 = vmatpush1.bf16.msra.mxu0 %v2085_v51  ;;  %v2152_v22 = vrot.slane %v2139_v7, %v1546_v27  ;;  %v2148_v51 = vrot.slane %v2139_v7, %v3755_v13 }
 0x797   :  { %2290 = vmatprep.subr.bf16.mxu1 %v2088_v34  ;;  %2454 = vmatprep.subr.bf16.mxu0 %v2090_v14  ;;  %v2156_v34 = vrot.slane %v2139_v7, %v1550_v49 }
 0x79a   :  { %2291 = vmatpush1.bf16.msra.mxu1 %v2087_v46  ;;  %2455 = vmatpush1.bf16.msra.mxu0 %v2089_v4 }
 0x79b   :  { %2292 = vmatprep.subr.bf16.mxu1 %v2092_v62  ;;  %2456 = vmatprep.subr.bf16.mxu0 %v2094_v38 }
 0x79e   :  { %2293 = vmatpush1.bf16.msra.mxu1 %v2091_v50  ;;  %2457 = vmatpush1.bf16.msra.mxu0 %v2093_v41 }
 0x79f   :  { %2294 = vmatprep.subr.bf16.mxu1 %v2096_v29  ;;  %2458 = vmatprep.subr.bf16.mxu0 %v2098_v57 }
 0x7a2   :  { %2295 = vmatpush1.bf16.msra.mxu1 %v2095_v45  ;;  %2459 = vmatpush1.bf16.msra.mxu0 %v2097_v35 }
 0x7a3   :  { %2296 = vmatprep.subr.bf16.mxu1 %v2100_v33  ;;  %2460 = vmatprep.subr.bf16.mxu0 %v2102_v0 }
 0x7a6   :  { %2297 = vmatpush1.bf16.msra.mxu1 %v2099_v12  ;;  %2461 = vmatpush1.bf16.msra.mxu0 %v2101_v17  ;;  %v4193_v17 = vld [vmem:[#allocation45_spill] sm:$0xff] }
 0x7a7   :  { %2298 = vmatprep.subr.bf16.mxu1 %v2104_v39  ;;  %2462 = vmatprep.subr.bf16.mxu0 %v2106_v52 }
 0x7aa   :  { %2299 = vmatpush1.bf16.msra.mxu1 %v2103_v30  ;;  %2463 = vmatpush1.bf16.msra.mxu0 %v2105_v47 }
 0x7ab   :  { %2300 = vmatprep.subr.bf16.mxu1 %v2108_v32  ;;  %2464 = vmatprep.subr.bf16.mxu0 %v2110_v24 }
 0x7ae   :  { %2301 = vmatpush1.bf16.msra.mxu1 %v2107_v25  ;;  %2465 = vmatpush1.bf16.msra.mxu0 %v2109_v54 }
 0x7af   :  { %2302 = vmatprep.subr.bf16.mxu1 %v2112_v44  ;;  %2466 = vmatprep.subr.bf16.mxu0 %v2114_v48 }
 0x7b2   :  { %2303 = vmatpush1.bf16.msra.mxu1 %v2111_v26  ;;  %2467 = vmatpush1.bf16.msra.mxu0 %v2113_v10 }
 0x7b3   :  { %2304 = vmatprep.subr.bf16.mxu1 %v2116_v63  ;;  %2468 = vmatprep.subr.bf16.mxu0 %v2118_v8 }
 0x7b6   :  { %2305 = vmatpush1.bf16.msra.mxu1 %v2115_v23  ;;  %2469 = vmatpush1.bf16.msra.mxu0 %v2117_v20 }
 0x7b7   :  { %2306 = vmatprep.subr.bf16.mxu1 %v2120_v15  ;;  %2470 = vmatprep.subr.bf16.mxu0 %v2122_v53 }
 0x7ba   :  { %2307 = vmatpush1.bf16.msra.mxu1 %v2119_v28  ;;  %2471 = vmatpush1.bf16.msra.mxu0 %v2121_v11 }
 0x7bb   :  { %2308 = vmatprep.subr.bf16.mxu1 %v2124_v6  ;;  %2472 = vmatprep.subr.bf16.mxu0 %v2126_v42 }
 0x7be   :  { %2309 = vmatpush1.bf16.msra.mxu1 %v2123_v37  ;;  %2473 = vmatpush1.bf16.msra.mxu0 %v2125_v36 }
 0x7bf   :  { %2310 = vmatprep.subr.bf16.mxu1 %v2128_v43  ;;  %2474 = vmatprep.subr.bf16.mxu0 %v2130_v1 }
 0x7c2   :  { %2311 = vmatpush1.bf16.msra.mxu1 %v2127_v56  ;;  %2475 = vmatpush1.bf16.msra.mxu0 %v2129_v16 }
 0x7c3   :  { %2312 = vmatprep.subr.bf16.mxu1 %v2132_v60  ;;  %2476 = vmatprep.subr.bf16.mxu0 %v2134_v58 }
 0x7c6   :  { %2313 = vmatpush1.bf16.msra.mxu1 %v2131_v31  ;;  %2477 = vmatpush1.bf16.msra.mxu0 %v2133_v2 }
 0x7c7   :  { %2314 = vmatprep.subr.bf16.mxu1 %v2136_v9  ;;  %2478 = vmatprep.subr.bf16.mxu0 %v2138_v55 }
 0x7ca   :  { %2315 = vmatpush1.bf16.msra.mxu1 %v2135_v59  ;;  %2479 = vmatpush1.bf16.msra.mxu0 %v2137_v21 }
 0x7cb   :  { %2744 = vmatprep.subr.bf16.mxu1 %v3334_v5  ;;  %2766 = vmatprep.subr.bf16.mxu0 %v4193_v17 }
 0x7cd   :  { %2317 = vmatmul.mubr.bf16.vlgmr.msra.gmra.mrb[8].mxu1 %v1881_v40  ;;  %2481 = vmatmul.mubr.bf16.vlgmr.msra.gmra.mrb[16].mxu0 %v1881_v40 }
 0x8a0   :  { %v2318_v14 = vpop.f32.mrb[8].mxu1  ;;  %v2482_v61 = vpop.f32.mrb[16].mxu0 }
 0x8a1   :  { %v2883_v46 = vadd.f32 %v2318_v14, %v2144_v18  ;;  %v2885_v4 = vadd.f32 %v2482_v61, %v2152_v22  ;;  %v2320_v62 = vpop.f32.mrb[9].mxu1  ;;  %v2484_v38 = vpop.f32.mrb[17].mxu0 }
 0x8a2   :  { %v2884_v50 = vadd.f32 %v2320_v62, %v2148_v51  ;;  %v2886_v41 = vadd.f32 %v2484_v38, %v2156_v34  ;;  %v2322_v29 = vpop.f32.mrb[10].mxu1  ;;  %v2486_v57 = vpop.f32.mrb[18].mxu0 }
 0x8a3   :  { %vm2489_vm7 = vcmp.ge.f32.partialorder %v2883_v46, 0.0  ;;  %v2493_v3 = vmul.f32 0.2, %v2883_v46  ;;  %vm2491_vm8 = vcmp.ge.f32.partialorder %v2885_v4, 0.0  ;;  %v2495_v45 = vmul.f32 0.2, %v2885_v4 }
 0x8a4   :  { %vm2490_vm9 = vcmp.ge.f32.partialorder %v2884_v50, 0.0  ;;  %v2494_v27 = vmul.f32 0.2, %v2884_v50  ;;  %vm2492_vm10 = vcmp.ge.f32.partialorder %v2886_v41, 0.0  ;;  %v2496_v13 = vmul.f32 0.2, %v2886_v41 }
 0x8a5   :  { %v2497_v19 = vsel %vm2489_vm7, %v2883_v46, %v2493_v3  ;;  %v2499_v49 = vsel %vm2491_vm8, %v2885_v4, %v2495_v45  ;;  %v2323_v35 = vpop.f32.mrb[11].mxu1  ;;  %v2487_v33 = vpop.f32.mrb[19].mxu0 }
 0x8a6   :  { %v2498_v0 = vsel %vm2490_vm9, %v2884_v50, %v2494_v27  ;;  %v2500_v12 = vsel %vm2492_vm10, %v2886_v41, %v2496_v13 }
 0x8a7   :  { %v2506_v39 = vpack.c.bf16 %v2498_v0, %v2498_v0  ;;  %v2508_v52 = vpack.c.bf16 %v2500_v12, %v2500_v12 }
 0x8a8   :  { %3008 = dma.done.wait [#allocation5 + $0x2], 4096 }
 0x8a9   :  { %3009 = vsyncadd [#allocation5 + $0x2], 4294963200  ;;  %v4194_v30 = vld [vmem:[#allocation22_spill] sm:$0xff]  ;;  %v4195_v47 = vld [vmem:[#allocation37_spill] sm:$0xff]  ;;  %2580 = vmatprep.mubr.bf16.mxu1 %v2506_v39  ;;  %2620 = vmatprep.mubr.bf16.mxu0 %v2508_v52  ;;  %v2505_v58 = vpack.c.bf16 %v2497_v19, %v2497_v19  ;;  %v2507_v31 = vpack.c.bf16 %v2499_v49, %v2499_v49  ;;  %s3029_s7 = smov [#allocation10]  }
 0x8aa   :  { %2745 = vmatpush3.bf16.msra.mxu1 %v4194_v30  ;;  %2767 = vmatpush3.bf16.msra.mxu0 %v4195_v47  ;;  %v4196_v32 = vld [vmem:[#allocation30_spill] sm:$0xff]  ;;  %v4198_v25 = vld [vmem:[#allocation23_spill] sm:$0xff]  ;;  %v4202_v48 = vld [vmem:[#allocation24_spill] sm:$0xff]  ;;  %s2646_s15 = sshll.u32 %s3029_s7, 4  ;;  %s2647_s15 = int_to_ptr.vmem [resolvable:$true] %s2646_s15 }
 0x8ab   :  { %2746 = vmatprep.subr.bf16.mxu1 %v4196_v32  ;;  %v4197_v24 = vld [vmem:[#allocation46_spill] sm:$0xff]  ;;  %v4200_v5 = vld [vmem:[#allocation31_spill] sm:$0xff]  ;;  %v4204_v10 = vld [vmem:[#allocation32_spill] sm:$0xff]  ;;  %s2958_s16 = scalar_lea.vmem %s2647_s15, 32  ;;  %p2963_p9 = scmp.lt.s32.totalorder %s2647_s15, %s2647_s15 }
 0x8ac   :  { %2768 = vmatprep.subr.bf16.mxu0 %v4197_v24  ;;  %v4199_v54 = vld [vmem:[#allocation38_spill] sm:$0xff]  ;;  %v4201_v44 = vld [vmem:[#allocation47_spill] sm:$0xff]  ;;  %v4205_v63 = vld [vmem:[#allocation48_spill] sm:$0xff]  ;;  %p2959_p8 = scmp.ne.s32.totalorder %s2647_s15, %s2958_s16  ;;  %p2964_p10 = scmp.lt.s32.totalorder %s2958_s16, %s2958_s16 }
 0x8ad   :  { %v4203_v26 = vld [vmem:[#allocation39_spill] sm:$0xff]  ;;  %v4206_v8 = vld [vmem:[#allocation25_spill] sm:$0xff]  ;;  %v4207_v23 = vld [vmem:[#allocation40_spill] sm:$0xff] }
 0x8ae   :  { %2747 = vmatpush3.bf16.msra.mxu1 %v4198_v25  ;;  %2769 = vmatpush3.bf16.msra.mxu0 %v4199_v54  ;;  %v4208_v20 = vld [vmem:[#allocation33_spill] sm:$0xff]  ;;  %v4210_v53 = vld [vmem:[#allocation26_spill] sm:$0xff]  ;;  %v4214_v42 = vld [vmem:[#allocation27_spill] sm:$0xff]  ;;  %p2965_p11 = por %p2964_p10, %p2963_p9 }
 0x8af   :  { %2748 = vmatprep.subr.bf16.mxu1 %v4200_v5  ;;  %2770 = vmatprep.subr.bf16.mxu0 %v4201_v44  ;;  %v4209_v15 = vld [vmem:[#allocation49_spill] sm:$0xff]  ;;  %v4212_v11 = vld [vmem:[#allocation34_spill] sm:$0xff]  ;;  %v4216_v36 = vld [vmem:[#allocation35_spill] sm:$0xff] }
 0x8b0   :  { %v4211_v28 = vld [vmem:[#allocation41_spill] sm:$0xff]  ;;  %v4213_v6 = vld [vmem:[#allocation50_spill] sm:$0xff]  ;;  %v4217_v43 = vld [vmem:[#allocation51_spill] sm:$0xff]  ;;  %p2966_p12 = pnand %p2965_p11, %p2959_p8 }
 0x8b1   :  { %v4215_v37 = vld [vmem:[#allocation42_spill] sm:$0xff]  ;;  %v4218_v1 = vld [vmem:[#allocation28_spill] sm:$0xff]  ;;  %v4219_v56 = vld [vmem:[#allocation43_spill] sm:$0xff] }
 0x8b2   :  { %2749 = vmatpush3.bf16.msra.mxu1 %v4202_v48  ;;  %2771 = vmatpush3.bf16.msra.mxu0 %v4203_v26  ;;  %v4220_v16 = vld [vmem:[#allocation36_spill] sm:$0xff]  ;;  %v4222_v2 = vld [vmem:[#allocation29_spill] sm:$0xff] }
 0x8b3   :  { %2750 = vmatprep.subr.bf16.mxu1 %v4204_v10  ;;  %2772 = vmatprep.subr.bf16.mxu0 %v4205_v63  ;;  %v4221_v60 = vld [vmem:[#allocation52_spill] sm:$0xff] }
 0x8b4   :  { %v4223_v9 = vld [vmem:[#allocation44_spill] sm:$0xff] }
 0x8b6   :  { %2751 = vmatpush3.bf16.msra.mxu1 %v4206_v8  ;;  %2773 = vmatpush3.bf16.msra.mxu0 %v4207_v23 }
 0x8b7   :  { %2752 = vmatprep.subr.bf16.mxu1 %v4208_v20  ;;  %2774 = vmatprep.subr.bf16.mxu0 %v4209_v15 }
 0x8ba   :  { %2753 = vmatpush3.bf16.msra.mxu1 %v4210_v53  ;;  %2775 = vmatpush3.bf16.msra.mxu0 %v4211_v28 }
 0x8bb   :  { %2754 = vmatprep.subr.bf16.mxu1 %v4212_v11  ;;  %2776 = vmatprep.subr.bf16.mxu0 %v4213_v6 }
 0x8be   :  { %2755 = vmatpush3.bf16.msra.mxu1 %v4214_v42  ;;  %2777 = vmatpush3.bf16.msra.mxu0 %v4215_v37 }
 0x8bf   :  { %2756 = vmatprep.subr.bf16.mxu1 %v4216_v36  ;;  %2778 = vmatprep.subr.bf16.mxu0 %v4217_v43 }
 0x8c2   :  { %2757 = vmatpush3.bf16.msra.mxu1 %v4218_v1  ;;  %2779 = vmatpush3.bf16.msra.mxu0 %v4219_v56 }
 0x8c3   :  { %2758 = vmatprep.subr.bf16.mxu1 %v4220_v16  ;;  %2780 = vmatprep.subr.bf16.mxu0 %v4221_v60 }
 0x8c6   :  { %2759 = vmatpush3.bf16.msra.mxu1 %v4222_v2  ;;  %2781 = vmatpush3.bf16.msra.mxu0 %v4223_v9 }
 0x8c9   :  { %2581 = vmatmul.mubr.bf16.vlgmr.msra.gmra.mrb[12].mxu1 %v2505_v58  ;;  %2621 = vmatmul.mubr.bf16.vlgmr.msra.gmra.mrb[20].mxu0 %v2507_v31 }
 0x8ca   :  { %2969 = shalt.err (!%p2966_p12)
}
 0x8cb   :  { %s2970_s19 = scalar_lea.hbm %s4156_s11, 32 }
 0x8cc   :  { %p2971_p13 = scmp.ne.s32.totalorder %s4156_s11, %s2970_s19  ;;  %p2974_p0 = scmp.lt.u32.totalorder %s2970_s19, %s4156_s11 }
 0x8ce   :  { %p2976_p1 = pnand %p2974_p0, %p2971_p13 }
 0x8d0   :  { %2979 = shalt.err (!%p2976_p1)
}
 0x8d1   :  { %2649 = dma.vmem_to_hbm [thread:$0]  %s2647_s15, 32, %s4156_s11, [#allocation11]   ;;  %v2712_v21 = vld [vmem:[%s4154_s9] ss:$0 sm:$0xff]  ;;  %vm2628_vm11 = vcmask 50176  }
 0x8d2   :  { %s3030_s27 = smov [#allocation9]  }
 0x8d3   :  { %s2636_s28 = sshll.u32 %s3030_s27, 4  ;;  %s2637_s28 = int_to_ptr.vmem [resolvable:$true] %s2636_s28 }
 0x8d4   :  { %s2980_s11 = scalar_lea.vmem %s2637_s28, 32  ;;  %p2985_p3 = scmp.lt.s32.totalorder %s2637_s28, %s2637_s28 }
 0x8d5   :  { %p2981_p2 = scmp.ne.s32.totalorder %s2637_s28, %s2980_s11  ;;  %p2986_p4 = scmp.lt.s32.totalorder %s2980_s11, %s2980_s11 }
 0x8d7   :  { %p2987_p5 = por %p2986_p4, %p2985_p3 }
 0x8d9   :  { %p2988_p6 = pnand %p2987_p5, %p2981_p2 }
 0x99c   :  { %v2760_v55 = vpop.f32.mrb[12].mxu1  ;;  %v2782_v59 = vpop.f32.mrb[20].mxu0 }
 0x99d   :  { %v2761_v40 = vpop.f32.mrb[13].mxu1  ;;  %v2783_v7 = vpop.f32.mrb[21].mxu0 }
 0x99e   :  { %v2762_v18 = vadd.f32 %v2761_v40, %v2760_v55  ;;  %v2784_v22 = vadd.f32 %v2783_v7, %v2782_v59  ;;  %v2763_v51 = vpop.f32.mrb[14].mxu1  ;;  %v2785_v34 = vpop.f32.mrb[22].mxu0 }
 0x99f   :  { %v2764_v14 = vpop.f32.mrb[15].mxu1  ;;  %v2786_v61 = vpop.f32.mrb[23].mxu0 }
 0x9a0   :  { %v2583_v46 = vadd.f32 %v2762_v18, %v2712_v21 }
 0x9a2   :  { %v2623_v4 = vadd.f32 %v2784_v22, %v2583_v46 }
 0x9a4   :  { %2629 = vst.msk [vmem:[#allocation9] sm:$0x3] %vm2628_vm11, %v2623_v4 }
 0x9a5   :  { %2991 = shalt.err (!%p2988_p6)
}
 0x9a6   :  { %s2992_s29 = scalar_lea.hbm %s4155_s10, 32 }
 0x9a7   :  { %p2993_p7 = scmp.ne.s32.totalorder %s4155_s10, %s2992_s29  ;;  %p2996_p8 = scmp.lt.u32.totalorder %s2992_s29, %s4155_s10 }
 0x9a9   :  { %p2998_p9 = pnand %p2996_p8, %p2993_p7 }
 0x9ab   :  { %3001 = shalt.err (!%p2998_p9)
}
 0x9ac   :  { %2639 = dma.vmem_to_hbm [thread:$0]  %s2637_s28, 32, %s4155_s10, [#allocation8]  }
 0x9ad   :  { %3010 = dma.done.wait [#allocation8], 32  }
 0x9ae   :  { %3011 = vsyncadd [#allocation8], 4294967264 }
 0x9af   :  { %3012 = dma.done.wait [#allocation11], 32  }
 0x9b0   :  { %3013 = vsyncadd [#allocation11], 4294967264 }
 0x9b1   :  { %2656 = vsyncpa [#allocation7], 1 }
 0x9b2   :  { %2657 = vsyncpa [#allocation8], 1 }
 0x9b3   :  { %2658 = vsyncpa [#allocation11], 1 }
 0x9b4   :  { %2659 = vsyncmov [#allocation5] }
 0x9b7   :  { %s2660_s3 = vpop.sfrf %2659 }
 0x9b8   :  { %p2713_p10 = scmp.ne.s32.totalorder %s2660_s3, 0 }
 0x9ba   :  { %2664 = shalt.err (%p2713_p10)  }
 0x9bb   :  { %2666 = vsyncmov [#allocation5 + $0x1] }
 0x9be   :  { %s2667_s17 = vpop.sfrf %2666 }
 0x9bf   :  { %p2714_p11 = scmp.ne.s32.totalorder %s2667_s17, 0 }
 0x9c1   :  { %2671 = shalt.err (%p2714_p11)  }
 0x9c2   :  { %2673 = vsyncmov [#allocation5 + $0x2] }
 0x9c5   :  { %s2674_s5 = vpop.sfrf %2673 }
 0x9c6   :  { %p2715_p12 = scmp.ne.s32.totalorder %s2674_s5, 0 }
 0x9c8   :  { %2678 = shalt.err (%p2715_p12)  }

</bundles_post_ra>
